<compile_context>
chip_gen: v6e
topology: v6e:2x2x1
jax: 0.10.0
libtpu: 0.0.40
codegen_flags: <defaults>
</compile_context>

<pallas_src>
import jax
import jax.numpy as jnp
from jax import lax
from jax.experimental import pallas as pl
from jax.experimental.pallas import tpu as pltpu


def _round_up(n, m):
    return ((n + m - 1) // m) * m


def _mlp_kernel(x_ref, w1_ref, b1_ref, w2_ref, b2_ref, w3_ref, b3_ref, o_ref):
    # x tile: (TB, 392) f32.  All matmuls accumulate in f32 on the MXU;
    # activations run in f32 on the VPU/EUP.
    x = x_ref[...]

    h1 = jnp.dot(x, w1_ref[...], preferred_element_type=jnp.float32) + b1_ref[...]
    h1 = jnp.maximum(h1, 0.0)                                    # relu

    h2 = jnp.dot(h1, w2_ref[...], preferred_element_type=jnp.float32) + b2_ref[...]
    h2 = jnp.maximum(h2, 0.0)                                    # relu

    # Final layer, lane-dense: contract the feature dim of BOTH operands so the
    # batch dim lands on the lane axis of the result:
    #   (1, 8) · (TB, 8) -> (1, TB)        [same pattern as q @ k.T]
    z = lax.dot_general(w3_ref[...], h2, (((1,), (1,)), ((), ())),
                        preferred_element_type=jnp.float32) + b3_ref[...]

    # exact sigmoid (outputs stay in [0, 1])
    o_ref[0] = 1.0 / (1.0 + jnp.exp(-z))


def net_forward(x, params, *, tb=8192):
    """x: (B, 392) float32 -> (B, 1) float32."""
    w1, b1, w2, b2, w3, b3 = params     # w3: (1, 8), b3: (1, 1)
    B, K = x.shape

    # Tile size: multiple of 128 (lane-dense output), never much bigger than B.
    tb = min(tb, _round_up(max(B, 1), 128))
    nb = pl.cdiv(B, tb)                 # ragged tail handled by Pallas masking

    out = pl.pallas_call(
        _mlp_kernel,
        out_shape=jax.ShapeDtypeStruct((nb, 1, tb), jnp.float32),
        grid=(nb,),
        in_specs=[
            # batch-tiled activations (auto double-buffered DMA pipeline)
            pl.BlockSpec((tb, K), lambda i: (i, 0)),
            # weights/biases: constant block index -> fetched once, stay resident
            pl.BlockSpec(w1.shape, lambda i: (0, 0)),
            pl.BlockSpec(b1.shape, lambda i: (0, 0)),
            pl.BlockSpec(w2.shape, lambda i: (0, 0)),
            pl.BlockSpec(b2.shape, lambda i: (0, 0)),
            pl.BlockSpec(w3.shape, lambda i: (0, 0)),
            pl.BlockSpec(b3.shape, lambda i: (0, 0)),
        ],
        # lane-dense output slab: one (1, 1, TB) row per grid step
        out_specs=pl.BlockSpec((1, 1, tb), lambda i: (i, 0, 0)),
        compiler_params=pltpu.CompilerParams(
            dimension_semantics=("parallel",)),
    )(x, w1, b1, w2, b2, w3, b3)

    # (nb, 1, tb) -> flat -> drop the (garbage) ragged-tail rows -> (B, 1)
    return out.reshape(-1)[:B].reshape(B, 1)


def init_params(key):
    """Deterministic init mimicking PyTorch's default Linear init (U(-1/sqrt(fan_in), +))."""
    def linear(key, fan_in, fan_out, *, w_shape, b_shape):
        kw, kb = jax.random.split(key)
        bound = 1.0 / jnp.sqrt(fan_in)
        w = jax.random.uniform(kw, w_shape, jnp.float32, -bound, bound)
        b = jax.random.uniform(kb, b_shape, jnp.float32, -bound, bound)
        return w, b

    k1, k2, k3 = jax.random.split(key, 3)
    # W1/W2 stored (in, out); W3 stored (out, in) = (1, 8) for the lane-dense finale.
    w1, b1 = linear(k1, 2 * 14 * 14, 8, w_shape=(2 * 14 * 14, 8), b_shape=(1, 8))
    w2, b2 = linear(k2, 8, 8, w_shape=(8, 8), b_shape=(1, 8))
    w3, b3 = linear(k3, 8, 1, w_shape=(1, 8), b_shape=(1, 1))
    return (w1, b1, w2, b2, w3, b3)


if __name__ == "__main__":
    key = jax.random.PRNGKey(0)
    k_params, k_x = jax.random.split(key)

    params = init_params(k_params)

    # Small-but-ragged batch: exercises both the single-tile path (default tb)
    # and the multi-tile path with a masked ragged tail (tb=128 -> 3 grid steps).
    B = 300
    x = jax.random.normal(k_x, (B, 2 * 14 * 14), dtype=jnp.float32)

    out_big = jax.block_until_ready(net_forward(x, params))           # 1 tile
    out_small = jax.block_until_ready(net_forward(x, params, tb=128))  # 3 tiles + ragged tail

    # pure-JAX f32 reference
    w1, b1, w2, b2, w3, b3 = params
    h1 = jnp.maximum(x @ w1 + b1, 0.0)
    h2 = jnp.maximum(h1 @ w2 + b2, 0.0)
    ref = jax.nn.sigmoid(h2 @ w3.T + b3)

    for out in (out_big, out_small):
        assert out.shape == (B, 1)
        assert bool(jnp.all(jnp.isfinite(out)))
        assert bool(jnp.all((out >= 0.0) & (out <= 1.0)))
        assert bool(jnp.allclose(out, ref, atol=1e-2, rtol=1e-2))

    print("KERNEL_OK")
</pallas_src>

<mosaic_0001>
module attributes {stable_mosaic.version = 11 : i64} {
  func.func @_mlp_kernel(%arg0: i32, %arg1: memref<384x392xf32, #tpu.memory_space<vmem>>, %arg2: memref<392x8xf32, #tpu.memory_space<vmem>>, %arg3: memref<1x8xf32, #tpu.memory_space<vmem>>, %arg4: memref<8x8xf32, #tpu.memory_space<vmem>>, %arg5: memref<1x8xf32, #tpu.memory_space<vmem>>, %arg6: memref<1x8xf32, #tpu.memory_space<vmem>>, %arg7: memref<1x1xf32, #tpu.memory_space<vmem>>, %arg8: memref<1x1x384xf32, #tpu.memory_space<vmem>>) attributes {dimension_semantics = [#tpu.dimension_semantics<parallel>], iteration_bounds = array<i64: 1>, scalar_prefetch = 0 : i64, scratch_operands = 0 : i64, tpu.core_type = #tpu.core_type<tc>, window_params = [{transform_indices = @transform_0, window_bounds = array<i64: 384, 392>}, {pipeline_mode = #tpu.pipeline_mode<synchronous>, transform_indices = @transform_1, window_bounds = array<i64: 392, 8>}, {pipeline_mode = #tpu.pipeline_mode<synchronous>, transform_indices = @transform_2, window_bounds = array<i64: 1, 8>}, {pipeline_mode = #tpu.pipeline_mode<synchronous>, transform_indices = @transform_3, window_bounds = array<i64: 8, 8>}, {pipeline_mode = #tpu.pipeline_mode<synchronous>, transform_indices = @transform_4, window_bounds = array<i64: 1, 8>}, {pipeline_mode = #tpu.pipeline_mode<synchronous>, transform_indices = @transform_5, window_bounds = array<i64: 1, 8>}, {pipeline_mode = #tpu.pipeline_mode<synchronous>, transform_indices = @transform_6, window_bounds = array<i64: 1, 1>}, {transform_indices = @transform_7, window_bounds = array<i64: 1, 1, 384>}]} {
    %c0 = arith.constant 0 : index
    %c0_0 = arith.constant 0 : index
    %0 = vector.load %arg1[%c0, %c0_0] : memref<384x392xf32, #tpu.memory_space<vmem>>, vector<384x392xf32>
    %c0_1 = arith.constant 0 : index
    %c0_2 = arith.constant 0 : index
    %1 = vector.load %arg2[%c0_1, %c0_2] : memref<392x8xf32, #tpu.memory_space<vmem>>, vector<392x8xf32>
    %cst = arith.constant dense<0.000000e+00> : vector<384x8xf32>
    %2 = tpu.matmul %0, %1, %cst {dimension_numbers = #tpu.dot_dimension_numbers<[1], [0], [0], [1], [0, 0, 1, 1], [], []>} : vector<384x392xf32>, vector<392x8xf32>, vector<384x8xf32> -> vector<384x8xf32>
    %c0_3 = arith.constant 0 : index
    %c0_4 = arith.constant 0 : index
    %3 = vector.load %arg3[%c0_3, %c0_4] : memref<1x8xf32, #tpu.memory_space<vmem>>, vector<1x8xf32>
    %4 = vector.broadcast %3 : vector<1x8xf32> to vector<384x8xf32>
    %5 = arith.addf %2, %4 : vector<384x8xf32>
    %cst_5 = arith.constant 0.000000e+00 : f32
    %6 = vector.broadcast %cst_5 : f32 to vector<384x8xf32>
    %7 = arith.maximumf %5, %6 : vector<384x8xf32>
    %c0_6 = arith.constant 0 : index
    %c0_7 = arith.constant 0 : index
    %8 = vector.load %arg4[%c0_6, %c0_7] : memref<8x8xf32, #tpu.memory_space<vmem>>, vector<8x8xf32>
    %cst_8 = arith.constant dense<0.000000e+00> : vector<384x8xf32>
    %9 = tpu.matmul %7, %8, %cst_8 {dimension_numbers = #tpu.dot_dimension_numbers<[1], [0], [0], [1], [0, 0, 1, 1], [], []>} : vector<384x8xf32>, vector<8x8xf32>, vector<384x8xf32> -> vector<384x8xf32>
    %c0_9 = arith.constant 0 : index
    %c0_10 = arith.constant 0 : index
    %10 = vector.load %arg5[%c0_9, %c0_10] : memref<1x8xf32, #tpu.memory_space<vmem>>, vector<1x8xf32>
    %11 = vector.broadcast %10 : vector<1x8xf32> to vector<384x8xf32>
    %12 = arith.addf %9, %11 : vector<384x8xf32>
    %cst_11 = arith.constant 0.000000e+00 : f32
    %13 = vector.broadcast %cst_11 : f32 to vector<384x8xf32>
    %14 = arith.maximumf %12, %13 : vector<384x8xf32>
    %c0_12 = arith.constant 0 : index
    %c0_13 = arith.constant 0 : index
    %15 = vector.load %arg6[%c0_12, %c0_13] : memref<1x8xf32, #tpu.memory_space<vmem>>, vector<1x8xf32>
    %cst_14 = arith.constant dense<0.000000e+00> : vector<1x384xf32>
    %16 = tpu.matmul %15, %14, %cst_14 {dimension_numbers = #tpu.dot_dimension_numbers<[1], [1], [0], [0], [0, 0, 1, 0], [], []>} : vector<1x8xf32>, vector<384x8xf32>, vector<1x384xf32> -> vector<1x384xf32>
    %c0_15 = arith.constant 0 : index
    %c0_16 = arith.constant 0 : index
    %17 = vector.load %arg7[%c0_15, %c0_16] : memref<1x1xf32, #tpu.memory_space<vmem>>, vector<1x1xf32>
    %18 = vector.broadcast %17 : vector<1x1xf32> to vector<1x384xf32>
    %19 = arith.addf %16, %18 : vector<1x384xf32>
    %cst_17 = arith.constant 0.000000e+00 : f32
    %20 = vector.broadcast %cst_17 : f32 to vector<1x384xf32>
    %21 = arith.subf %20, %19 : vector<1x384xf32>
    %22 = math.exp %21 : vector<1x384xf32>
    %cst_18 = arith.constant 1.000000e+00 : f32
    %23 = vector.broadcast %cst_18 : f32 to vector<1x384xf32>
    %24 = arith.addf %23, %22 : vector<1x384xf32>
    %cst_19 = arith.constant 1.000000e+00 : f32
    %25 = vector.broadcast %cst_19 : f32 to vector<1x384xf32>
    %26 = arith.divf %25, %24 : vector<1x384xf32>
    %c0_20 = arith.constant 0 : index
    %c0_21 = arith.constant 0 : index
    %c0_22 = arith.constant 0 : index
    %27 = vector.load %arg8[%c0_20, %c0_21, %c0_22] : memref<1x1x384xf32, #tpu.memory_space<vmem>>, vector<1x1x384xf32>
    %28 = vector.shape_cast %27 : vector<1x1x384xf32> to vector<1x384xf32>
    %29 = vector.shape_cast %26 : vector<1x384xf32> to vector<1x1x384xf32>
    tpu.vector_store %arg8[%c0_20, %c0_21, %c0_22], %29 {strides = array<i32>} : memref<1x1x384xf32, #tpu.memory_space<vmem>>, vector<1x1x384xf32>,
    return
  }
  func.func @transform_0(%arg0: i32) -> (i32, i32) {
    %c0_i32 = arith.constant 0 : i32
    %c0_i32_0 = arith.constant 0 : i32
    return %arg0, %c0_i32 : i32, i32
  }
  func.func @transform_1(%arg0: i32) -> (i32, i32) {
    %c0_i32 = arith.constant 0 : i32
    %c0_i32_0 = arith.constant 0 : i32
    %c0_i32_1 = arith.constant 0 : i32
    return %c0_i32, %c0_i32_0 : i32, i32
  }
  func.func @transform_2(%arg0: i32) -> (i32, i32) {
    %c0_i32 = arith.constant 0 : i32
    %c0_i32_0 = arith.constant 0 : i32
    %c0_i32_1 = arith.constant 0 : i32
    return %c0_i32, %c0_i32_0 : i32, i32
  }
  func.func @transform_3(%arg0: i32) -> (i32, i32) {
    %c0_i32 = arith.constant 0 : i32
    %c0_i32_0 = arith.constant 0 : i32
    %c0_i32_1 = arith.constant 0 : i32
    return %c0_i32, %c0_i32_0 : i32, i32
  }
  func.func @transform_4(%arg0: i32) -> (i32, i32) {
    %c0_i32 = arith.constant 0 : i32
    %c0_i32_0 = arith.constant 0 : i32
    %c0_i32_1 = arith.constant 0 : i32
    return %c0_i32, %c0_i32_0 : i32, i32
  }
  func.func @transform_5(%arg0: i32) -> (i32, i32) {
    %c0_i32 = arith.constant 0 : i32
    %c0_i32_0 = arith.constant 0 : i32
    %c0_i32_1 = arith.constant 0 : i32
    return %c0_i32, %c0_i32_0 : i32, i32
  }
  func.func @transform_6(%arg0: i32) -> (i32, i32) {
    %c0_i32 = arith.constant 0 : i32
    %c0_i32_0 = arith.constant 0 : i32
    %c0_i32_1 = arith.constant 0 : i32
    return %c0_i32, %c0_i32_0 : i32, i32
  }
  func.func @transform_7(%arg0: i32) -> (i32, i32, i32) {
    %c0_i32 = arith.constant 0 : i32
    %c0_i32_0 = arith.constant 0 : i32
    %c0_i32_1 = arith.constant 0 : i32
    return %arg0, %c0_i32, %c0_i32_0 : i32, i32, i32
  }
}

</mosaic_0001>

<bundles_post_ra>
// kernel: tpu_custom_call.1
= control target key start
LH: loop header
LB: loop body
LE: loop exit
PB: predicated region body
PF: predicated region fallthrough
CT: control target
= control target key end

     0   :  { %s3524_s0 = inlined_call_operand.vmem [shape: f32[300,392], index: 0, kind: input, shape index: {}]   ;;  %s3525_s1 = inlined_call_operand.vmem [shape: f32[392,8], index: 1, kind: input, shape index: {}]   ;;  %s3526_s2 = inlined_call_operand.vmem [shape: f32[1,8], index: 2, kind: input, shape index: {}]   ;;  %s3527_s3 = inlined_call_operand.vmem [shape: f32[8,8], index: 3, kind: input, shape index: {}]   ;;  %s3528_s4 = inlined_call_operand.vmem [shape: f32[1,8], index: 4, kind: input, shape index: {}]   ;;  %s3529_s5 = inlined_call_operand.vmem [shape: f32[1,8], index: 5, kind: input, shape index: {}]   ;;  %s3530_s6 = inlined_call_operand.<no memory space> [shape: f32[1,1], index: 6, kind: input, shape index: {}]   ;;  %s3531_s7 = inlined_call_operand.hbm [shape: f32[1,1,384], index: 7, kind: output, shape index: {}]  }
   0x1   :  { %v12_v0 = vstv %s3530_s6 }
   0x2   :  { %13 = vst [vmem:[#allocation2] sm:$0x1] %v12_v0 }
   0x3   :  { %v236_v1 = vld [vmem:[%s3525_s1 + $0x78] sm:$0xff]  ;;  %v2345_v2 = vmov 0.0   ;;  %v235_v3 = vld [vmem:[%s3525_s1 + $0x70] sm:$0xff]  ;;  %v234_v4 = vld [vmem:[%s3525_s1 + $0x68] sm:$0xff]  ;;  %vm277_vm0 = vcmask 64512  }
   0x4   :  { %422 = vmatprep.subr.mxu0 %v2345_v2  ;;  %727 = vmatprep.subr.mxu1 %v2345_v2  ;;  %v233_v5 = vld [vmem:[%s3525_s1 + $0x60] sm:$0xff]  ;;  %v268_v6 = vld [vmem:[%s3525_s1 + $0x178] sm:$0xff]  ;;  %v267_v7 = vld [vmem:[%s3525_s1 + $0x170] sm:$0xff] }
   0x5   :  { %423 = vmatpush1.msra.mxu0 %v236_v1  ;;  %728 = vmatpush1.msra.mxu1 %v268_v6  ;;  %v232_v8 = vld [vmem:[%s3525_s1 + $0x58] sm:$0xff]  ;;  %v266_v9 = vld [vmem:[%s3525_s1 + $0x168] sm:$0xff]  ;;  %v231_v10 = vld [vmem:[%s3525_s1 + $0x50] sm:$0xff] }
   0x6   :  { %424 = vmatprep.subr.mxu0 %v2345_v2  ;;  %729 = vmatprep.subr.mxu1 %v2345_v2  ;;  %v265_v11 = vld [vmem:[%s3525_s1 + $0x160] sm:$0xff]  ;;  %v230_v12 = vld [vmem:[%s3525_s1 + $0x48] sm:$0xff]  ;;  %v264_v13 = vld [vmem:[%s3525_s1 + $0x158] sm:$0xff] }
   0x7   :  { %425 = vmatpush1.msra.mxu0 %v235_v3  ;;  %730 = vmatpush1.msra.mxu1 %v267_v7  ;;  %v229_v14 = vld [vmem:[%s3525_s1 + $0x40] sm:$0xff]  ;;  %v263_v15 = vld [vmem:[%s3525_s1 + $0x150] sm:$0xff]  ;;  %v228_v16 = vld [vmem:[%s3525_s1 + $0x38] sm:$0xff] }
   0x8   :  { %426 = vmatprep.subr.mxu0 %v2345_v2  ;;  %731 = vmatprep.subr.mxu1 %v2345_v2  ;;  %v262_v17 = vld [vmem:[%s3525_s1 + $0x148] sm:$0xff]  ;;  %v227_v18 = vld [vmem:[%s3525_s1 + $0x30] sm:$0xff]  ;;  %v261_v19 = vld [vmem:[%s3525_s1 + $0x140] sm:$0xff] }
   0x9   :  { %427 = vmatpush1.msra.mxu0 %v234_v4  ;;  %732 = vmatpush1.msra.mxu1 %v266_v9  ;;  %v226_v20 = vld [vmem:[%s3525_s1 + $0x28] sm:$0xff]  ;;  %v260_v21 = vld [vmem:[%s3525_s1 + $0x138] sm:$0xff]  ;;  %v225_v22 = vld [vmem:[%s3525_s1 + $0x20] sm:$0xff] }
   0xa   :  { %428 = vmatprep.subr.mxu0 %v2345_v2  ;;  %733 = vmatprep.subr.mxu1 %v2345_v2  ;;  %v259_v23 = vld [vmem:[%s3525_s1 + $0x130] sm:$0xff]  ;;  %v224_v24 = vld [vmem:[%s3525_s1 + $0x18] sm:$0xff]  ;;  %v258_v25 = vld [vmem:[%s3525_s1 + $0x128] sm:$0xff] }
   0xb   :  { %429 = vmatpush1.msra.mxu0 %v233_v5  ;;  %734 = vmatpush1.msra.mxu1 %v265_v11  ;;  %v223_v26 = vld [vmem:[%s3525_s1 + $0x10] sm:$0xff]  ;;  %v257_v27 = vld [vmem:[%s3525_s1 + $0x120] sm:$0xff]  ;;  %v222_v28 = vld [vmem:[%s3525_s1 + $0x8] sm:$0xff] }
   0xc   :  { %430 = vmatprep.subr.mxu0 %v2345_v2  ;;  %735 = vmatprep.subr.mxu1 %v2345_v2  ;;  %v256_v29 = vld [vmem:[%s3525_s1 + $0x118] sm:$0xff]  ;;  %v221_v30 = vld [vmem:[%s3525_s1] sm:$0xff]  ;;  %v255_v31 = vld [vmem:[%s3525_s1 + $0x110] sm:$0xff] }
   0xd   :  { %431 = vmatpush1.msra.mxu0 %v232_v8  ;;  %736 = vmatpush1.msra.mxu1 %v264_v13  ;;  %v252_v32 = vld [vmem:[%s3525_s1 + $0xf8] sm:$0xff]  ;;  %v254_v33 = vld [vmem:[%s3525_s1 + $0x108] sm:$0xff]  ;;  %v251_v34 = vld [vmem:[%s3525_s1 + $0xf0] sm:$0xff] }
   0xe   :  { %432 = vmatprep.subr.mxu0 %v2345_v2  ;;  %737 = vmatprep.subr.mxu1 %v2345_v2  ;;  %v253_v35 = vld [vmem:[%s3525_s1 + $0x100] sm:$0xff]  ;;  %v250_v36 = vld [vmem:[%s3525_s1 + $0xe8] sm:$0xff]  ;;  %v32_v40 = vld [vmem:[%s3524_s0 + $0x18] sm:$0xff] }
   0xf   :  { %433 = vmatpush1.msra.mxu0 %v231_v10  ;;  %738 = vmatpush1.msra.mxu1 %v263_v15  ;;  %v30_v37 = vld [vmem:[%s3524_s0 + $0x8] sm:$0xff]  ;;  %v269_v38 = vld [vmem:[%s3525_s1 + $0x180] sm:$0xff]  ;;  %v31_v41 = vld [vmem:[%s3524_s0 + $0x10] sm:$0xff] }
  0x10   :  { %434 = vmatprep.subr.mxu0 %v2345_v2  ;;  %739 = vmatprep.subr.mxu1 %v2345_v2  ;;  %v249_v39 = vld [vmem:[%s3525_s1 + $0xe0] sm:$0xff]  ;;  %v248_v42 = vld [vmem:[%s3525_s1 + $0xd8] sm:$0xff]  ;;  %v247_v44 = vld [vmem:[%s3525_s1 + $0xd0] sm:$0xff] }
  0x11   :  { %435 = vmatpush1.msra.mxu0 %v230_v12  ;;  %740 = vmatpush1.msra.mxu1 %v262_v17  ;;  %v36_v43 = vld [vmem:[%s3524_s0 + $0x38] sm:$0xff]  ;;  %v35_v45 = vld [vmem:[%s3524_s0 + $0x30] sm:$0xff]  ;;  %v246_v46 = vld [vmem:[%s3525_s1 + $0xc8] sm:$0xff] }
  0x12   :  { %436 = vmatprep.subr.mxu0 %v2345_v2  ;;  %741 = vmatprep.subr.mxu1 %v2345_v2  ;;  %v40_v47 = vld [vmem:[%s3524_s0 + $0x58] sm:$0xff]  ;;  %v245_v48 = vld [vmem:[%s3525_s1 + $0xc0] sm:$0xff]  ;;  %v39_v49 = vld [vmem:[%s3524_s0 + $0x50] sm:$0xff] }
  0x13   :  { %437 = vmatpush1.msra.mxu0 %v229_v14  ;;  %742 = vmatpush1.msra.mxu1 %v261_v19  ;;  %v244_v50 = vld [vmem:[%s3525_s1 + $0xb8] sm:$0xff]  ;;  %v243_v52 = vld [vmem:[%s3525_s1 + $0xb0] sm:$0xff]  ;;  %v242_v54 = vld [vmem:[%s3525_s1 + $0xa8] sm:$0xff] }
  0x14   :  { %438 = vmatprep.subr.mxu0 %v2345_v2  ;;  %743 = vmatprep.subr.mxu1 %v2345_v2  ;;  %v44_v51 = vld [vmem:[%s3524_s0 + $0x78] sm:$0xff]  ;;  %v43_v53 = vld [vmem:[%s3524_s0 + $0x70] sm:$0xff]  ;;  %v241_v56 = vld [vmem:[%s3525_s1 + $0xa0] sm:$0xff] }
  0x15   :  { %439 = vmatpush1.msra.mxu0 %v228_v16  ;;  %744 = vmatpush1.msra.mxu1 %v260_v21  ;;  %v48_v55 = vld [vmem:[%s3524_s0 + $0x98] sm:$0xff]  ;;  %v47_v57 = vld [vmem:[%s3524_s0 + $0x90] sm:$0xff] }
  0x16   :  { %440 = vmatprep.subr.mxu0 %v2345_v2  ;;  %745 = vmatprep.subr.mxu1 %v2345_v2  ;;  %v240_v58 = vld [vmem:[%s3525_s1 + $0x98] sm:$0xff]  ;;  %v239_v60 = vld [vmem:[%s3525_s1 + $0x90] sm:$0xff] }
  0x17   :  { %441 = vmatpush1.msra.mxu0 %v227_v18  ;;  %746 = vmatpush1.msra.mxu1 %v259_v23  ;;  %v52_v59 = vld [vmem:[%s3524_s0 + $0xb8] sm:$0xff]  ;;  %v51_v61 = vld [vmem:[%s3524_s0 + $0xb0] sm:$0xff] }
  0x18   :  { %442 = vmatprep.subr.mxu0 %v2345_v2  ;;  %747 = vmatprep.subr.mxu1 %v2345_v2 }
  0x19   :  { %443 = vmatpush1.msra.mxu0 %v226_v20  ;;  %748 = vmatpush1.msra.mxu1 %v258_v25 }
  0x1a   :  { %444 = vmatprep.subr.mxu0 %v2345_v2  ;;  %749 = vmatprep.subr.mxu1 %v2345_v2 }
  0x1b   :  { %445 = vmatpush1.msra.mxu0 %v225_v22  ;;  %750 = vmatpush1.msra.mxu1 %v257_v27 }
  0x1c   :  { %446 = vmatprep.subr.mxu0 %v2345_v2  ;;  %751 = vmatprep.subr.mxu1 %v2345_v2 }
  0x1d   :  { %447 = vmatpush1.msra.mxu0 %v224_v24  ;;  %752 = vmatpush1.msra.mxu1 %v256_v29 }
  0x1e   :  { %448 = vmatprep.subr.mxu0 %v2345_v2  ;;  %753 = vmatprep.subr.mxu1 %v2345_v2 }
  0x1f   :  { %449 = vmatpush1.msra.mxu0 %v223_v26  ;;  %754 = vmatpush1.msra.mxu1 %v255_v31 }
  0x20   :  { %450 = vmatprep.subr.mxu0 %v2345_v2  ;;  %755 = vmatprep.subr.mxu1 %v2345_v2 }
  0x21   :  { %451 = vmatpush1.msra.mxu0 %v222_v28  ;;  %756 = vmatpush1.msra.mxu1 %v254_v33 }
  0x22   :  { %452 = vmatprep.subr.mxu0 %v2345_v2  ;;  %757 = vmatprep.subr.mxu1 %v2345_v2 }
  0x23   :  { %453 = vmatpush1.msra.mxu0 %v221_v30  ;;  %758 = vmatpush1.msra.mxu1 %v253_v35 }
  0x24   :  { %454 = vmatprep.subr.mxu0 %v2345_v2  ;;  %789 = vmatprep.subr.mxu1 %v2345_v2 }
  0x25   :  { %455 = vmatpush2.msra.mxu0 %v252_v32  ;;  %486 = vmatprep.mubr.f32.mxu0 %v30_v37 }
  0x26   :  { %456 = vmatprep.subr.mxu0 %v2345_v2  ;;  %790 = vmatpush2.msra.mxu1 %v269_v38 }
  0x27   :  { %457 = vmatpush2.msra.mxu0 %v251_v34  ;;  %1949 = vmatprep.mubr.msk.f32.mxu1 %vm277_vm0, %v32_v40 }
  0x28   :  { %458 = vmatprep.subr.mxu0 %v2345_v2  ;;  %792 = vmatmul.mubr.f32.vlgmr.msra.gmra.mxu1 %v31_v41 }
  0x29   :  { %459 = vmatpush2.msra.mxu0 %v250_v36  ;;  %1950 = vmatprep.mubr.msk.f32.mxu1 %vm277_vm0, %v36_v43 }
  0x2a   :  { %460 = vmatprep.subr.mxu0 %v2345_v2 }
  0x2b   :  { %461 = vmatpush2.msra.mxu0 %v249_v39 }
  0x2c   :  { %462 = vmatprep.subr.mxu0 %v2345_v2  ;;  %797 = vmatmul.mubr.f32.gmra.mxu1 %v35_v45 }
  0x2d   :  { %463 = vmatpush2.msra.mxu0 %v248_v42  ;;  %1951 = vmatprep.mubr.msk.f32.mxu1 %vm277_vm0, %v40_v47 }
  0x2e   :  { %464 = vmatprep.subr.mxu0 %v2345_v2 }
  0x2f   :  { %465 = vmatpush2.msra.mxu0 %v247_v44 }
  0x30   :  { %466 = vmatprep.subr.mxu0 %v2345_v2  ;;  %802 = vmatmul.mubr.f32.gmra.mxu1 %v39_v49 }
  0x31   :  { %467 = vmatpush2.msra.mxu0 %v246_v46  ;;  %1952 = vmatprep.mubr.msk.f32.mxu1 %vm277_vm0, %v44_v51 }
  0x32   :  { %468 = vmatprep.subr.mxu0 %v2345_v2 }
  0x33   :  { %469 = vmatpush2.msra.mxu0 %v245_v48 }
  0x34   :  { %470 = vmatprep.subr.mxu0 %v2345_v2  ;;  %807 = vmatmul.mubr.f32.gmra.mxu1 %v43_v53 }
  0x35   :  { %471 = vmatpush2.msra.mxu0 %v244_v50  ;;  %1953 = vmatprep.mubr.msk.f32.mxu1 %vm277_vm0, %v48_v55 }
  0x36   :  { %472 = vmatprep.subr.mxu0 %v2345_v2 }
  0x37   :  { %473 = vmatpush2.msra.mxu0 %v243_v52 }
  0x38   :  { %474 = vmatprep.subr.mxu0 %v2345_v2  ;;  %812 = vmatmul.mubr.f32.gmra.mxu1 %v47_v57 }
  0x39   :  { %475 = vmatpush2.msra.mxu0 %v242_v54  ;;  %1954 = vmatprep.mubr.msk.f32.mxu1 %vm277_vm0, %v52_v59 }
  0x3a   :  { %476 = vmatprep.subr.mxu0 %v2345_v2 }
  0x3b   :  { %477 = vmatpush2.msra.mxu0 %v241_v56 }
  0x3c   :  { %478 = vmatprep.subr.mxu0 %v2345_v2 }
  0x3d   :  { %479 = vmatpush2.msra.mxu0 %v240_v58 }
  0x3e   :  { %14 = vsyncpa [#allocation4], 0  ;;  %480 = vmatprep.subr.mxu0 %v2345_v2  ;;  %v238_v62 = vld [vmem:[%s3525_s1 + $0x88] sm:$0xff]  ;;  %v56_v63 = vld [vmem:[%s3524_s0 + $0xd8] sm:$0xff]  ;;  %817 = vmatmul.mubr.f32.gmra.mxu1 %v51_v61  ;;  %vm2347_vm1 = vmmov 0  }
  0x3f   :  { %481 = vmatpush2.msra.mxu0 %v239_v60  ;;  %v237_v0 = vld [vmem:[%s3525_s1 + $0x80] sm:$0xff]  ;;  %1955 = vmatprep.mubr.msk.f32.mxu1 %vm277_vm0, %v56_v63  ;;  %v55_v3 = vld [vmem:[%s3524_s0 + $0xd0] sm:$0xff]  ;;  %v34_v4 = vld [vmem:[%s3524_s0 + $0x28] sm:$0xff] }
  0x40   :  { %482 = vmatprep.subr.mxu0 %v2345_v2  ;;  %v29_v1 = vld [vmem:[%s3524_s0] sm:$0xff]  ;;  %v60_v5 = vld [vmem:[%s3524_s0 + $0xf8] sm:$0xff]  ;;  %v59_v7 = vld [vmem:[%s3524_s0 + $0xf0] sm:$0xff] }
  0x41   :  { %483 = vmatpush2.msra.mxu0 %v238_v62  ;;  %v33_v6 = vld [vmem:[%s3524_s0 + $0x20] sm:$0xff]  ;;  %v38_v8 = vld [vmem:[%s3524_s0 + $0x48] sm:$0xff]  ;;  %v64_v9 = vld [vmem:[%s3524_s0 + $0x118] sm:$0xff] }
  0x42   :  { %484 = vmatprep.subr.mxu0 %v2345_v2  ;;  %822 = vmatmul.mubr.f32.gmra.mxu1 %v55_v3  ;;  %v37_v10 = vld [vmem:[%s3524_s0 + $0x40] sm:$0xff]  ;;  %v63_v11 = vld [vmem:[%s3524_s0 + $0x110] sm:$0xff]  ;;  %v42_v12 = vld [vmem:[%s3524_s0 + $0x68] sm:$0xff] }
  0x43   :  { %485 = vmatpush2.msra.mxu0 %v237_v0  ;;  %1956 = vmatprep.mubr.msk.f32.mxu1 %vm277_vm0, %v60_v5  ;;  %v68_v13 = vld [vmem:[%s3524_s0 + $0x138] sm:$0xff]  ;;  %v41_v14 = vld [vmem:[%s3524_s0 + $0x60] sm:$0xff]  ;;  %v67_v15 = vld [vmem:[%s3524_s0 + $0x130] sm:$0xff] }
  0x44   :  { %487 = vmatmul.mubr.f32.vlgmr.msra.gmra.mxu0 %v29_v1  ;;  %v46_v16 = vld [vmem:[%s3524_s0 + $0x88] sm:$0xff]  ;;  %v72_v17 = vld [vmem:[%s3524_s0 + $0x158] sm:$0xff]  ;;  %v45_v18 = vld [vmem:[%s3524_s0 + $0x80] sm:$0xff] }
  0x45   :  { %491 = vmatprep.mubr.f32.mxu0 %v34_v4  ;;  %v71_v19 = vld [vmem:[%s3524_s0 + $0x150] sm:$0xff]  ;;  %v50_v20 = vld [vmem:[%s3524_s0 + $0xa8] sm:$0xff]  ;;  %v76_v21 = vld [vmem:[%s3524_s0 + $0x178] sm:$0xff] }
  0x46   :  { %827 = vmatmul.mubr.f32.gmra.mxu1 %v59_v7  ;;  %v49_v22 = vld [vmem:[%s3524_s0 + $0xa0] sm:$0xff]  ;;  %v75_v23 = vld [vmem:[%s3524_s0 + $0x170] sm:$0xff]  ;;  %v54_v24 = vld [vmem:[%s3524_s0 + $0xc8] sm:$0xff] }
  0x47   :  { %1957 = vmatprep.mubr.msk.f32.mxu1 %vm277_vm0, %v64_v9  ;;  %v80_v25 = vld [vmem:[%s3524_s0 + $0x198] sm:$0xff]  ;;  %v53_v26 = vld [vmem:[%s3524_s0 + $0xc0] sm:$0xff]  ;;  %v79_v27 = vld [vmem:[%s3524_s0 + $0x190] sm:$0xff] }
  0x48   :  { %492 = vmatmul.mubr.f32.gmra.mxu0 %v33_v6  ;;  %v58_v28 = vld [vmem:[%s3524_s0 + $0xe8] sm:$0xff]  ;;  %v84_v29 = vld [vmem:[%s3524_s0 + $0x1b8] sm:$0xff]  ;;  %v57_v30 = vld [vmem:[%s3524_s0 + $0xe0] sm:$0xff] }
  0x49   :  { %496 = vmatprep.mubr.f32.mxu0 %v38_v8  ;;  %v83_v31 = vld [vmem:[%s3524_s0 + $0x1b0] sm:$0xff]  ;;  %v62_v32 = vld [vmem:[%s3524_s0 + $0x108] sm:$0xff]  ;;  %v88_v33 = vld [vmem:[%s3524_s0 + $0x1d8] sm:$0xff] }
  0x4a   :  { %832 = vmatmul.mubr.f32.gmra.mxu1 %v63_v11  ;;  %v61_v34 = vld [vmem:[%s3524_s0 + $0x100] sm:$0xff]  ;;  %v87_v35 = vld [vmem:[%s3524_s0 + $0x1d0] sm:$0xff]  ;;  %v66_v36 = vld [vmem:[%s3524_s0 + $0x128] sm:$0xff] }
  0x4b   :  { %1958 = vmatprep.mubr.msk.f32.mxu1 %vm277_vm0, %v68_v13  ;;  %v92_v37 = vld [vmem:[%s3524_s0 + $0x1f8] sm:$0xff]  ;;  %v65_v38 = vld [vmem:[%s3524_s0 + $0x120] sm:$0xff]  ;;  %v91_v39 = vld [vmem:[%s3524_s0 + $0x1f0] sm:$0xff] }
  0x4c   :  { %497 = vmatmul.mubr.f32.gmra.mxu0 %v37_v10  ;;  %v70_v40 = vld [vmem:[%s3524_s0 + $0x148] sm:$0xff]  ;;  %v96_v41 = vld [vmem:[%s3524_s0 + $0x218] sm:$0xff]  ;;  %v69_v42 = vld [vmem:[%s3524_s0 + $0x140] sm:$0xff] }
  0x4d   :  { %501 = vmatprep.mubr.f32.mxu0 %v42_v12  ;;  %v95_v43 = vld [vmem:[%s3524_s0 + $0x210] sm:$0xff]  ;;  %v74_v44 = vld [vmem:[%s3524_s0 + $0x168] sm:$0xff]  ;;  %v100_v45 = vld [vmem:[%s3524_s0 + $0x238] sm:$0xff] }
  0x4e   :  { %837 = vmatmul.mubr.f32.gmra.mxu1 %v67_v15  ;;  %v73_v46 = vld [vmem:[%s3524_s0 + $0x160] sm:$0xff]  ;;  %v99_v47 = vld [vmem:[%s3524_s0 + $0x230] sm:$0xff]  ;;  %v78_v48 = vld [vmem:[%s3524_s0 + $0x188] sm:$0xff] }
  0x4f   :  { %1959 = vmatprep.mubr.msk.f32.mxu1 %vm277_vm0, %v72_v17  ;;  %v104_v49 = vld [vmem:[%s3524_s0 + $0x258] sm:$0xff]  ;;  %v77_v50 = vld [vmem:[%s3524_s0 + $0x180] sm:$0xff]  ;;  %v103_v51 = vld [vmem:[%s3524_s0 + $0x250] sm:$0xff] }
  0x50   :  { %502 = vmatmul.mubr.f32.gmra.mxu0 %v41_v14  ;;  %v82_v52 = vld [vmem:[%s3524_s0 + $0x1a8] sm:$0xff]  ;;  %v108_v53 = vld [vmem:[%s3524_s0 + $0x278] sm:$0xff]  ;;  %v81_v54 = vld [vmem:[%s3524_s0 + $0x1a0] sm:$0xff] }
  0x51   :  { %506 = vmatprep.mubr.f32.mxu0 %v46_v16  ;;  %v107_v55 = vld [vmem:[%s3524_s0 + $0x270] sm:$0xff]  ;;  %v86_v56 = vld [vmem:[%s3524_s0 + $0x1c8] sm:$0xff]  ;;  %v112_v57 = vld [vmem:[%s3524_s0 + $0x298] sm:$0xff] }
  0x52   :  { %842 = vmatmul.mubr.f32.gmra.mxu1 %v71_v19  ;;  %v85_v58 = vld [vmem:[%s3524_s0 + $0x1c0] sm:$0xff]  ;;  %v111_v59 = vld [vmem:[%s3524_s0 + $0x290] sm:$0xff]  ;;  %v90_v60 = vld [vmem:[%s3524_s0 + $0x1e8] sm:$0xff] }
  0x53   :  { %1960 = vmatprep.mubr.msk.f32.mxu1 %vm277_vm0, %v76_v21  ;;  %v116_v61 = vld [vmem:[%s3524_s0 + $0x2b8] sm:$0xff]  ;;  %v89_v62 = vld [vmem:[%s3524_s0 + $0x1e0] sm:$0xff]  ;;  %v115_v63 = vld [vmem:[%s3524_s0 + $0x2b0] sm:$0xff] }
  0x54   :  { %507 = vmatmul.mubr.f32.gmra.mxu0 %v45_v18  ;;  %v94_v0 = vld [vmem:[%s3524_s0 + $0x208] sm:$0xff]  ;;  %v120_v1 = vld [vmem:[%s3524_s0 + $0x2d8] sm:$0xff]  ;;  %v93_v3 = vld [vmem:[%s3524_s0 + $0x200] sm:$0xff] }
  0x55   :  { %511 = vmatprep.mubr.f32.mxu0 %v50_v20  ;;  %v119_v4 = vld [vmem:[%s3524_s0 + $0x2d0] sm:$0xff]  ;;  %v98_v5 = vld [vmem:[%s3524_s0 + $0x228] sm:$0xff]  ;;  %v124_v6 = vld [vmem:[%s3524_s0 + $0x2f8] sm:$0xff] }
  0x56   :  { %847 = vmatmul.mubr.f32.gmra.mxu1 %v75_v23  ;;  %v97_v7 = vld [vmem:[%s3524_s0 + $0x220] sm:$0xff]  ;;  %v123_v8 = vld [vmem:[%s3524_s0 + $0x2f0] sm:$0xff]  ;;  %v102_v9 = vld [vmem:[%s3524_s0 + $0x248] sm:$0xff] }
  0x57   :  { %1961 = vmatprep.mubr.msk.f32.mxu1 %vm277_vm0, %v80_v25  ;;  %v128_v10 = vld [vmem:[%s3524_s0 + $0x318] sm:$0xff]  ;;  %v101_v11 = vld [vmem:[%s3524_s0 + $0x240] sm:$0xff]  ;;  %v127_v12 = vld [vmem:[%s3524_s0 + $0x310] sm:$0xff] }
  0x58   :  { %512 = vmatmul.mubr.f32.gmra.mxu0 %v49_v22  ;;  %v106_v13 = vld [vmem:[%s3524_s0 + $0x268] sm:$0xff]  ;;  %v132_v14 = vld [vmem:[%s3524_s0 + $0x338] sm:$0xff]  ;;  %v1080_v15 = vld [vmem:[%s3527_s3] sm:$0xff] }
  0x59   :  { %516 = vmatprep.mubr.f32.mxu0 %v54_v24  ;;  %v105_v16 = vld [vmem:[%s3524_s0 + $0x260] sm:$0xff]  ;;  %v131_v17 = vld [vmem:[%s3524_s0 + $0x330] sm:$0xff]  ;;  %v110_v18 = vld [vmem:[%s3524_s0 + $0x288] sm:$0xff]  ;;  %2196 = vmatprep.subr.mxu1 %v1080_v15 }
  0x5a   :  { %852 = vmatmul.mubr.f32.gmra.mxu1 %v79_v27  ;;  %v136_v19 = vld [vmem:[%s3524_s0 + $0x358] sm:$0xff]  ;;  %v109_v20 = vld [vmem:[%s3524_s0 + $0x280] sm:$0xff]  ;;  %v135_v21 = vld [vmem:[%s3524_s0 + $0x350] sm:$0xff] }
  0x5b   :  { %1962 = vmatprep.mubr.msk.f32.mxu1 %vm277_vm0, %v84_v29  ;;  %2197 = vmatpush3.msra.mxu1 %v1080_v15  ;;  %v114_v22 = vld [vmem:[%s3524_s0 + $0x2a8] sm:$0xff]  ;;  %v140_v23 = vld [vmem:[%s3524_s0 + $0x378] sm:$0xff]  ;;  %v113_v24 = vld [vmem:[%s3524_s0 + $0x2a0] sm:$0xff] }
  0x5c   :  { %517 = vmatmul.mubr.f32.gmra.mxu0 %v53_v26  ;;  %v139_v25 = vld [vmem:[%s3524_s0 + $0x370] sm:$0xff]  ;;  %v118_v26 = vld [vmem:[%s3524_s0 + $0x2c8] sm:$0xff]  ;;  %v144_v27 = vld [vmem:[%s3524_s0 + $0x398] sm:$0xff] }
  0x5d   :  { %521 = vmatprep.mubr.f32.mxu0 %v58_v28  ;;  %v117_v28 = vld [vmem:[%s3524_s0 + $0x2c0] sm:$0xff]  ;;  %v143_v29 = vld [vmem:[%s3524_s0 + $0x390] sm:$0xff]  ;;  %v170_v15 = vld [vmem:[%s3524_s0 + $0x468] sm:$0xff] }
  0x5e   :  { %857 = vmatmul.mubr.f32.gmra.mxu1 %v83_v31  ;;  %v148_v31 = vld [vmem:[%s3524_s0 + $0x3b8] sm:$0xff] }
  0x5f   :  { %1963 = vmatprep.mubr.msk.f32.mxu1 %vm277_vm0, %v88_v33  ;;  %v147_v33 = vld [vmem:[%s3524_s0 + $0x3b0] sm:$0xff] }
  0x60   :  { %522 = vmatmul.mubr.f32.gmra.mxu0 %v57_v30  ;;  %v122_v30 = vld [vmem:[%s3524_s0 + $0x2e8] sm:$0xff] }
  0x61   :  { %526 = vmatprep.mubr.f32.mxu0 %v62_v32  ;;  %v121_v32 = vld [vmem:[%s3524_s0 + $0x2e0] sm:$0xff] }
  0x62   :  { %862 = vmatmul.mubr.f32.gmra.mxu1 %v87_v35  ;;  %v152_v35 = vld [vmem:[%s3524_s0 + $0x3d8] sm:$0xff] }
  0x63   :  { %1964 = vmatprep.mubr.msk.f32.mxu1 %vm277_vm0, %v92_v37  ;;  %v151_v37 = vld [vmem:[%s3524_s0 + $0x3d0] sm:$0xff] }
  0x64   :  { %527 = vmatmul.mubr.f32.gmra.mxu0 %v61_v34  ;;  %v126_v34 = vld [vmem:[%s3524_s0 + $0x308] sm:$0xff] }
  0x65   :  { %531 = vmatprep.mubr.f32.mxu0 %v66_v36  ;;  %v125_v36 = vld [vmem:[%s3524_s0 + $0x300] sm:$0xff] }
  0x66   :  { %867 = vmatmul.mubr.f32.gmra.mxu1 %v91_v39  ;;  %v156_v39 = vld [vmem:[%s3524_s0 + $0x3f8] sm:$0xff] }
  0x67   :  { %1965 = vmatprep.mubr.msk.f32.mxu1 %vm277_vm0, %v96_v41  ;;  %v155_v41 = vld [vmem:[%s3524_s0 + $0x3f0] sm:$0xff] }
  0x68   :  { %532 = vmatmul.mubr.f32.gmra.mxu0 %v65_v38  ;;  %v130_v38 = vld [vmem:[%s3524_s0 + $0x328] sm:$0xff] }
  0x69   :  { %536 = vmatprep.mubr.f32.mxu0 %v70_v40  ;;  %v129_v40 = vld [vmem:[%s3524_s0 + $0x320] sm:$0xff] }
  0x6a   :  { %872 = vmatmul.mubr.f32.gmra.mxu1 %v95_v43  ;;  %v160_v43 = vld [vmem:[%s3524_s0 + $0x418] sm:$0xff] }
  0x6b   :  { %1966 = vmatprep.mubr.msk.f32.mxu1 %vm277_vm0, %v100_v45  ;;  %v159_v45 = vld [vmem:[%s3524_s0 + $0x410] sm:$0xff] }
  0x6c   :  { %537 = vmatmul.mubr.f32.gmra.mxu0 %v69_v42  ;;  %v134_v42 = vld [vmem:[%s3524_s0 + $0x348] sm:$0xff] }
  0x6d   :  { %541 = vmatprep.mubr.f32.mxu0 %v74_v44  ;;  %v133_v44 = vld [vmem:[%s3524_s0 + $0x340] sm:$0xff] }
  0x6e   :  { %877 = vmatmul.mubr.f32.gmra.mxu1 %v99_v47  ;;  %v164_v47 = vld [vmem:[%s3524_s0 + $0x438] sm:$0xff] }
  0x6f   :  { %1967 = vmatprep.mubr.msk.f32.mxu1 %vm277_vm0, %v104_v49  ;;  %v163_v49 = vld [vmem:[%s3524_s0 + $0x430] sm:$0xff] }
  0x70   :  { %542 = vmatmul.mubr.f32.gmra.mxu0 %v73_v46  ;;  %v138_v46 = vld [vmem:[%s3524_s0 + $0x368] sm:$0xff] }
  0x71   :  { %546 = vmatprep.mubr.f32.mxu0 %v78_v48  ;;  %v137_v48 = vld [vmem:[%s3524_s0 + $0x360] sm:$0xff] }
  0x72   :  { %882 = vmatmul.mubr.f32.gmra.mxu1 %v103_v51  ;;  %v168_v51 = vld [vmem:[%s3524_s0 + $0x458] sm:$0xff] }
  0x73   :  { %1968 = vmatprep.mubr.msk.f32.mxu1 %vm277_vm0, %v108_v53  ;;  %v167_v53 = vld [vmem:[%s3524_s0 + $0x450] sm:$0xff] }
  0x74   :  { %547 = vmatmul.mubr.f32.gmra.mxu0 %v77_v50  ;;  %v142_v50 = vld [vmem:[%s3524_s0 + $0x388] sm:$0xff] }
  0x75   :  { %551 = vmatprep.mubr.f32.mxu0 %v82_v52  ;;  %v141_v52 = vld [vmem:[%s3524_s0 + $0x380] sm:$0xff] }
  0x76   :  { %887 = vmatmul.mubr.f32.gmra.mxu1 %v107_v55  ;;  %v172_v55 = vld [vmem:[%s3524_s0 + $0x478] sm:$0xff] }
  0x77   :  { %1969 = vmatprep.mubr.msk.f32.mxu1 %vm277_vm0, %v112_v57  ;;  %v171_v57 = vld [vmem:[%s3524_s0 + $0x470] sm:$0xff] }
  0x78   :  { %552 = vmatmul.mubr.f32.gmra.mxu0 %v81_v54  ;;  %v146_v54 = vld [vmem:[%s3524_s0 + $0x3a8] sm:$0xff] }
  0x79   :  { %556 = vmatprep.mubr.f32.mxu0 %v86_v56  ;;  %v145_v56 = vld [vmem:[%s3524_s0 + $0x3a0] sm:$0xff] }
  0x7a   :  { %892 = vmatmul.mubr.f32.gmra.mxu1 %v111_v59  ;;  %v176_v59 = vld [vmem:[%s3524_s0 + $0x498] sm:$0xff] }
  0x7b   :  { %1970 = vmatprep.mubr.msk.f32.mxu1 %vm277_vm0, %v116_v61  ;;  %v175_v61 = vld [vmem:[%s3524_s0 + $0x490] sm:$0xff] }
  0x7c   :  { %557 = vmatmul.mubr.f32.gmra.mxu0 %v85_v58  ;;  %v150_v58 = vld [vmem:[%s3524_s0 + $0x3c8] sm:$0xff] }
  0x7d   :  { %561 = vmatprep.mubr.f32.mxu0 %v90_v60  ;;  %v149_v60 = vld [vmem:[%s3524_s0 + $0x3c0] sm:$0xff] }
  0x7e   :  { %897 = vmatmul.mubr.f32.gmra.mxu1 %v115_v63  ;;  %v180_v63 = vld [vmem:[%s3524_s0 + $0x4b8] sm:$0xff] }
  0x7f   :  { %1971 = vmatprep.mubr.msk.f32.mxu1 %vm277_vm0, %v120_v1  ;;  %v179_v1 = vld [vmem:[%s3524_s0 + $0x4b0] sm:$0xff] }
  0x80   :  { %562 = vmatmul.mubr.f32.gmra.mxu0 %v89_v62  ;;  %v154_v62 = vld [vmem:[%s3524_s0 + $0x3e8] sm:$0xff] }
  0x81   :  { %566 = vmatprep.mubr.f32.mxu0 %v94_v0  ;;  %v153_v0 = vld [vmem:[%s3524_s0 + $0x3e0] sm:$0xff] }
  0x82   :  { %902 = vmatmul.mubr.f32.gmra.mxu1 %v119_v4  ;;  %v184_v4 = vld [vmem:[%s3524_s0 + $0x4d8] sm:$0xff] }
  0x83   :  { %1972 = vmatprep.mubr.msk.f32.mxu1 %vm277_vm0, %v124_v6  ;;  %v183_v6 = vld [vmem:[%s3524_s0 + $0x4d0] sm:$0xff] }
  0x84   :  { %567 = vmatmul.mubr.f32.gmra.mxu0 %v93_v3  ;;  %v158_v3 = vld [vmem:[%s3524_s0 + $0x408] sm:$0xff] }
  0x85   :  { %571 = vmatprep.mubr.f32.mxu0 %v98_v5  ;;  %v157_v5 = vld [vmem:[%s3524_s0 + $0x400] sm:$0xff] }
  0x86   :  { %907 = vmatmul.mubr.f32.gmra.mxu1 %v123_v8  ;;  %v188_v8 = vld [vmem:[%s3524_s0 + $0x4f8] sm:$0xff] }
  0x87   :  { %1973 = vmatprep.mubr.msk.f32.mxu1 %vm277_vm0, %v128_v10  ;;  %v187_v10 = vld [vmem:[%s3524_s0 + $0x4f0] sm:$0xff] }
  0x88   :  { %572 = vmatmul.mubr.f32.gmra.mxu0 %v97_v7  ;;  %v162_v7 = vld [vmem:[%s3524_s0 + $0x428] sm:$0xff] }
  0x89   :  { %576 = vmatprep.mubr.f32.mxu0 %v102_v9  ;;  %v161_v9 = vld [vmem:[%s3524_s0 + $0x420] sm:$0xff] }
  0x8a   :  { %912 = vmatmul.mubr.f32.gmra.mxu1 %v127_v12  ;;  %v192_v12 = vld [vmem:[%s3524_s0 + $0x518] sm:$0xff] }
  0x8b   :  { %1974 = vmatprep.mubr.msk.f32.mxu1 %vm277_vm0, %v132_v14  ;;  %v191_v14 = vld [vmem:[%s3524_s0 + $0x510] sm:$0xff] }
  0x8c   :  { %577 = vmatmul.mubr.f32.gmra.mxu0 %v101_v11  ;;  %v166_v11 = vld [vmem:[%s3524_s0 + $0x448] sm:$0xff] }
  0x8d   :  { %581 = vmatprep.mubr.f32.mxu0 %v106_v13  ;;  %v165_v13 = vld [vmem:[%s3524_s0 + $0x440] sm:$0xff] }
  0x8e   :  { %917 = vmatmul.mubr.f32.gmra.mxu1 %v131_v17  ;;  %v169_v17 = vld [vmem:[%s3524_s0 + $0x460] sm:$0xff] }
  0x8f   :  { %1975 = vmatprep.mubr.msk.f32.mxu1 %vm277_vm0, %v136_v19  ;;  %v174_v19 = vld [vmem:[%s3524_s0 + $0x488] sm:$0xff] }
  0x90   :  { %582 = vmatmul.mubr.f32.gmra.mxu0 %v105_v16  ;;  %v196_v16 = vld [vmem:[%s3524_s0 + $0x538] sm:$0xff] }
  0x91   :  { %586 = vmatprep.mubr.f32.mxu0 %v110_v18  ;;  %v195_v18 = vld [vmem:[%s3524_s0 + $0x530] sm:$0xff] }
  0x92   :  { %922 = vmatmul.mubr.f32.gmra.mxu1 %v135_v21  ;;  %v173_v21 = vld [vmem:[%s3524_s0 + $0x480] sm:$0xff] }
  0x93   :  { %1976 = vmatprep.mubr.msk.f32.mxu1 %vm277_vm0, %v140_v23  ;;  %v178_v23 = vld [vmem:[%s3524_s0 + $0x4a8] sm:$0xff] }
  0x94   :  { %587 = vmatmul.mubr.f32.gmra.mxu0 %v109_v20  ;;  %v200_v20 = vld [vmem:[%s3524_s0 + $0x558] sm:$0xff] }
  0x95   :  { %591 = vmatprep.mubr.f32.mxu0 %v114_v22  ;;  %v199_v22 = vld [vmem:[%s3524_s0 + $0x550] sm:$0xff] }
  0x96   :  { %927 = vmatmul.mubr.f32.gmra.mxu1 %v139_v25  ;;  %v177_v25 = vld [vmem:[%s3524_s0 + $0x4a0] sm:$0xff] }
  0x97   :  { %1977 = vmatprep.mubr.msk.f32.mxu1 %vm277_vm0, %v144_v27  ;;  %v182_v27 = vld [vmem:[%s3524_s0 + $0x4c8] sm:$0xff] }
  0x98   :  { %592 = vmatmul.mubr.f32.gmra.mxu0 %v113_v24  ;;  %v204_v24 = vld [vmem:[%s3524_s0 + $0x578] sm:$0xff] }
  0x99   :  { %596 = vmatprep.mubr.f32.mxu0 %v118_v26  ;;  %v203_v26 = vld [vmem:[%s3524_s0 + $0x570] sm:$0xff] }
  0x9a   :  { %932 = vmatmul.mubr.f32.gmra.mxu1 %v143_v29  ;;  %v181_v29 = vld [vmem:[%s3524_s0 + $0x4c0] sm:$0xff] }
  0x9b   :  { %1978 = vmatprep.mubr.msk.f32.mxu1 %vm277_vm0, %v148_v31  ;;  %v186_v31 = vld [vmem:[%s3524_s0 + $0x4e8] sm:$0xff] }
  0x9c   :  { %597 = vmatmul.mubr.f32.gmra.mxu0 %v117_v28  ;;  %v208_v28 = vld [vmem:[%s3524_s0 + $0x598] sm:$0xff] }
  0x9d   :  { %601 = vmatprep.mubr.f32.mxu0 %v122_v30  ;;  %v207_v30 = vld [vmem:[%s3524_s0 + $0x590] sm:$0xff] }
  0x9e   :  { %937 = vmatmul.mubr.f32.gmra.mxu1 %v147_v33  ;;  %v185_v33 = vld [vmem:[%s3524_s0 + $0x4e0] sm:$0xff] }
  0x9f   :  { %1979 = vmatprep.mubr.msk.f32.mxu1 %vm277_vm0, %v152_v35  ;;  %v190_v35 = vld [vmem:[%s3524_s0 + $0x508] sm:$0xff] }
  0xa0   :  { %602 = vmatmul.mubr.f32.gmra.mxu0 %v121_v32  ;;  %v212_v32 = vld [vmem:[%s3524_s0 + $0x5b8] sm:$0xff] }
  0xa1   :  { %606 = vmatprep.mubr.f32.mxu0 %v126_v34  ;;  %v211_v34 = vld [vmem:[%s3524_s0 + $0x5b0] sm:$0xff] }
  0xa2   :  { %942 = vmatmul.mubr.f32.gmra.mxu1 %v151_v37  ;;  %v189_v37 = vld [vmem:[%s3524_s0 + $0x500] sm:$0xff] }
  0xa3   :  { %1980 = vmatprep.mubr.msk.f32.mxu1 %vm277_vm0, %v156_v39  ;;  %v194_v39 = vld [vmem:[%s3524_s0 + $0x528] sm:$0xff] }
  0xa4   :  { %607 = vmatmul.mubr.f32.gmra.mxu0 %v125_v36  ;;  %v216_v36 = vld [vmem:[%s3524_s0 + $0x5d8] sm:$0xff] }
  0xa5   :  { %611 = vmatprep.mubr.f32.mxu0 %v130_v38  ;;  %v215_v38 = vld [vmem:[%s3524_s0 + $0x5d0] sm:$0xff] }
  0xa6   :  { %947 = vmatmul.mubr.f32.gmra.mxu1 %v155_v41  ;;  %v193_v41 = vld [vmem:[%s3524_s0 + $0x520] sm:$0xff] }
  0xa7   :  { %1981 = vmatprep.mubr.msk.f32.mxu1 %vm277_vm0, %v160_v43  ;;  %v198_v43 = vld [vmem:[%s3524_s0 + $0x548] sm:$0xff] }
  0xa8   :  { %612 = vmatmul.mubr.f32.gmra.mxu0 %v129_v40  ;;  %v220_v40 = vld [vmem:[%s3524_s0 + $0x5f8] sm:$0xff] }
  0xa9   :  { %616 = vmatprep.mubr.f32.mxu0 %v134_v42  ;;  %v219_v42 = vld [vmem:[%s3524_s0 + $0x5f0] sm:$0xff] }
  0xaa   :  { %952 = vmatmul.mubr.f32.gmra.mxu1 %v159_v45  ;;  %v202_v45 = vld [vmem:[%s3524_s0 + $0x568] sm:$0xff] }
  0xab   :  { %1982 = vmatprep.mubr.msk.f32.mxu1 %vm277_vm0, %v164_v47  ;;  %v201_v47 = vld [vmem:[%s3524_s0 + $0x560] sm:$0xff] }
  0xac   :  { %617 = vmatmul.mubr.f32.gmra.mxu0 %v133_v44  ;;  %v197_v44 = vld [vmem:[%s3524_s0 + $0x540] sm:$0xff] }
  0xad   :  { %621 = vmatprep.mubr.f32.mxu0 %v138_v46 }
  0xae   :  { %957 = vmatmul.mubr.f32.gmra.mxu1 %v163_v49 }
  0xaf   :  { %1983 = vmatprep.mubr.msk.f32.mxu1 %vm277_vm0, %v168_v51  ;;  %v205_v51 = vld [vmem:[%s3524_s0 + $0x580] sm:$0xff] }
  0xb0   :  { %622 = vmatmul.mubr.f32.gmra.mxu0 %v137_v48  ;;  %v206_v48 = vld [vmem:[%s3524_s0 + $0x588] sm:$0xff] }
  0xb1   :  { %626 = vmatprep.mubr.f32.mxu0 %v142_v50 }
  0xb2   :  { %962 = vmatmul.mubr.f32.gmra.mxu1 %v167_v53 }
  0xb3   :  { %1984 = vmatprep.mubr.msk.f32.mxu1 %vm277_vm0, %v172_v55  ;;  %v209_v55 = vld [vmem:[%s3524_s0 + $0x5a0] sm:$0xff] }
  0xb4   :  { %627 = vmatmul.mubr.f32.gmra.mxu0 %v141_v52  ;;  %v210_v52 = vld [vmem:[%s3524_s0 + $0x5a8] sm:$0xff] }
  0xb5   :  { %631 = vmatprep.mubr.f32.mxu0 %v146_v54 }
  0xb6   :  { %967 = vmatmul.mubr.f32.gmra.mxu1 %v171_v57 }
  0xb7   :  { %1985 = vmatprep.mubr.msk.f32.mxu1 %vm277_vm0, %v176_v59  ;;  %v213_v59 = vld [vmem:[%s3524_s0 + $0x5c0] sm:$0xff] }
  0xb8   :  { %632 = vmatmul.mubr.f32.gmra.mxu0 %v145_v56  ;;  %v214_v56 = vld [vmem:[%s3524_s0 + $0x5c8] sm:$0xff] }
  0xb9   :  { %636 = vmatprep.mubr.f32.mxu0 %v150_v58 }
  0xba   :  { %972 = vmatmul.mubr.f32.gmra.mxu1 %v175_v61 }
  0xbb   :  { %1986 = vmatprep.mubr.msk.f32.mxu1 %vm277_vm0, %v180_v63  ;;  %v217_v63 = vld [vmem:[%s3524_s0 + $0x5e0] sm:$0xff] }
  0xbc   :  { %637 = vmatmul.mubr.f32.gmra.mxu0 %v149_v60  ;;  %v218_v60 = vld [vmem:[%s3524_s0 + $0x5e8] sm:$0xff] }
  0xbd   :  { %641 = vmatprep.mubr.f32.mxu0 %v154_v62 }
  0xbe   :  { %977 = vmatmul.mubr.f32.gmra.mxu1 %v179_v1 }
  0xbf   :  { %1987 = vmatprep.mubr.msk.f32.mxu1 %vm277_vm0, %v184_v4 }
  0xc0   :  { %642 = vmatmul.mubr.f32.gmra.mxu0 %v153_v0 }
  0xc1   :  { %646 = vmatprep.mubr.f32.mxu0 %v158_v3  ;;  %v3219_v3 = vld [vmem:[%s3526_s2] ss:$0 sm:$0xff] }
  0xc2   :  { %982 = vmatmul.mubr.f32.gmra.mxu1 %v183_v6 }
  0xc3   :  { %1988 = vmatprep.mubr.msk.f32.mxu1 %vm277_vm0, %v188_v8 }
  0xc4   :  { %647 = vmatmul.mubr.f32.gmra.mxu0 %v157_v5 }
  0xc5   :  { %651 = vmatprep.mubr.f32.mxu0 %v162_v7 }
  0xc6   :  { %987 = vmatmul.mubr.f32.gmra.mxu1 %v187_v10 }
  0xc7   :  { %1989 = vmatprep.mubr.msk.f32.mxu1 %vm277_vm0, %v192_v12 }
  0xc8   :  { %652 = vmatmul.mubr.f32.gmra.mxu0 %v161_v9 }
  0xc9   :  { %656 = vmatprep.mubr.f32.mxu0 %v166_v11 }
  0xca   :  { %992 = vmatmul.mubr.f32.gmra.mxu1 %v191_v14 }
  0xcb   :  { %1990 = vmatprep.mubr.msk.f32.mxu1 %vm277_vm0, %v196_v16 }
  0xcc   :  { %657 = vmatmul.mubr.f32.gmra.mxu0 %v165_v13 }
  0xcd   :  { %661 = vmatprep.mubr.f32.mxu0 %v170_v15 }
  0xce   :  { %997 = vmatmul.mubr.f32.gmra.mxu1 %v195_v18 }
  0xcf   :  { %1991 = vmatprep.mubr.msk.f32.mxu1 %vm277_vm0, %v200_v20 }
  0xd0   :  { %662 = vmatmul.mubr.f32.gmra.mxu0 %v169_v17 }
  0xd1   :  { %666 = vmatprep.mubr.f32.mxu0 %v174_v19 }
  0xd2   :  { %1002 = vmatmul.mubr.f32.gmra.mxu1 %v199_v22 }
  0xd3   :  { %1992 = vmatprep.mubr.msk.f32.mxu1 %vm277_vm0, %v204_v24 }
  0xd4   :  { %667 = vmatmul.mubr.f32.gmra.mxu0 %v173_v21 }
  0xd5   :  { %671 = vmatprep.mubr.f32.mxu0 %v178_v23 }
  0xd6   :  { %1007 = vmatmul.mubr.f32.gmra.mxu1 %v203_v26 }
  0xd7   :  { %1993 = vmatprep.mubr.msk.f32.mxu1 %vm277_vm0, %v208_v28 }
  0xd8   :  { %672 = vmatmul.mubr.f32.gmra.mxu0 %v177_v25 }
  0xd9   :  { %676 = vmatprep.mubr.f32.mxu0 %v182_v27 }
  0xda   :  { %1012 = vmatmul.mubr.f32.gmra.mxu1 %v207_v30 }
  0xdb   :  { %1994 = vmatprep.mubr.msk.f32.mxu1 %vm277_vm0, %v212_v32 }
  0xdc   :  { %677 = vmatmul.mubr.f32.gmra.mxu0 %v181_v29 }
  0xdd   :  { %681 = vmatprep.mubr.f32.mxu0 %v186_v31 }
  0xde   :  { %1017 = vmatmul.mubr.f32.gmra.mxu1 %v211_v34 }
  0xdf   :  { %1995 = vmatprep.mubr.msk.f32.mxu1 %vm277_vm0, %v216_v36 }
  0xe0   :  { %682 = vmatmul.mubr.f32.gmra.mxu0 %v185_v33 }
  0xe1   :  { %686 = vmatprep.mubr.f32.mxu0 %v190_v35 }
  0xe2   :  { %1022 = vmatmul.mubr.f32.gmra.mxu1 %v215_v38 }
  0xe3   :  { %1996 = vmatprep.mubr.msk.f32.mxu1 %vm277_vm0, %v220_v40 }
  0xe4   :  { %687 = vmatmul.mubr.f32.gmra.mxu0 %v189_v37 }
  0xe5   :  { %691 = vmatprep.mubr.f32.mxu0 %v194_v39 }
  0xe6   :  { %1027 = vmatmul.mubr.f32.gmra.mxu1 %v219_v42 }
  0xe8   :  { %692 = vmatmul.mubr.f32.gmra.mxu0 %v193_v41  ;;  %v793_v46 = vpop.f32.mrf.mxu1 }
  0xe9   :  { %696 = vmatprep.mubr.f32.mxu0 %v198_v43 }
  0xea   :  { %v795_v49 = vpop.f32.mrf.mxu1 }
  0xec   :  { %697 = vmatmul.mubr.f32.gmra.mxu0 %v197_v44  ;;  %v798_v50 = vpop.f32.mrf.mxu1 }
  0xed   :  { %701 = vmatprep.mubr.f32.mxu0 %v202_v45 }
  0xee   :  { %v800_v53 = vpop.f32.mrf.mxu1 }
  0xf0   :  { %702 = vmatmul.mubr.f32.gmra.mxu0 %v201_v47  ;;  %v803_v54 = vpop.f32.mrf.mxu1 }
  0xf1   :  { %706 = vmatprep.mubr.f32.mxu0 %v206_v48 }
  0xf2   :  { %v805_v57 = vpop.f32.mrf.mxu1 }
  0xf4   :  { %707 = vmatmul.mubr.f32.gmra.mxu0 %v205_v51  ;;  %v808_v58 = vpop.f32.mrf.mxu1 }
  0xf5   :  { %711 = vmatprep.mubr.f32.mxu0 %v210_v52 }
  0xf6   :  { %v810_v61 = vpop.f32.mrf.mxu1 }
  0xf8   :  { %712 = vmatmul.mubr.f32.gmra.mxu0 %v209_v55  ;;  %v813_v62 = vpop.f32.mrf.mxu1 }
  0xf9   :  { %716 = vmatprep.mubr.f32.mxu0 %v214_v56 }
  0xfa   :  { %v815_v0 = vpop.f32.mrf.mxu1 }
  0xfc   :  { %717 = vmatmul.mubr.f32.gmra.mxu0 %v213_v59 }
  0xfd   :  { %721 = vmatprep.mubr.f32.mxu0 %v218_v60 }
  0xfe   :  { %v818_v1 = vpop.f32.mrf.mxu1 }
 0x100   :  { %722 = vmatmul.mubr.f32.gmra.mxu0 %v217_v63  ;;  %v820_v4 = vpop.f32.mrf.mxu1 }
 0x102   :  { %v823_v6 = vpop.f32.mrf.mxu1 }
 0x104   :  { %v488_v5 = vpop.f32.mrf.mxu0  ;;  %v825_v9 = vpop.f32.mrf.mxu1 }
 0x105   :  { %v489_v7 = vadd.f32 %v3219_v3, %v488_v5 }
 0x106   :  { %v490_v8 = vpop.f32.mrf.mxu0  ;;  %v828_v12 = vpop.f32.mrf.mxu1 }
 0x107   :  { %v794_v10 = vadd.f32 %v793_v46, %v489_v7 }
 0x108   :  { %v493_v11 = vpop.f32.mrf.mxu0  ;;  %v830_v16 = vpop.f32.mrf.mxu1 }
 0x109   :  { %v1032_v13 = vmax.f32 %v794_v10, 0.0  ;;  %v494_v14 = vadd.f32 %v3219_v3, %v493_v11 }
 0x10a   :  { %v495_v15 = vpop.f32.mrf.mxu0  ;;  %v833_v19 = vpop.f32.mrf.mxu1 }
 0x10b   :  { %v799_v17 = vadd.f32 %v798_v50, %v494_v14  ;;  %2198 = vmatprep.mubr.msk.f32.mxu1 %vm277_vm0, %v1032_v13 }
 0x10c   :  { %v498_v18 = vpop.f32.mrf.mxu0  ;;  %v835_v23 = vpop.f32.mrf.mxu1 }
 0x10d   :  { %v1033_v20 = vmax.f32 %v799_v17, 0.0  ;;  %v499_v21 = vadd.f32 %v3219_v3, %v498_v18 }
 0x10e   :  { %v500_v22 = vpop.f32.mrf.mxu0  ;;  %v838_v26 = vpop.f32.mrf.mxu1 }
 0x10f   :  { %v804_v24 = vadd.f32 %v803_v54, %v499_v21  ;;  %2199 = vmatmul.mubr.msk.f32.vlgmr.msra.gmra.mxu1 %vm277_vm0, %v1033_v20 }
 0x110   :  { %v503_v25 = vpop.f32.mrf.mxu0  ;;  %v840_v30 = vpop.f32.mrf.mxu1 }
 0x111   :  { %v1034_v27 = vmax.f32 %v804_v24, 0.0  ;;  %v504_v28 = vadd.f32 %v3219_v3, %v503_v25 }
 0x112   :  { %v505_v29 = vpop.f32.mrf.mxu0  ;;  %v843_v33 = vpop.f32.mrf.mxu1 }
 0x113   :  { %v809_v31 = vadd.f32 %v808_v58, %v504_v28  ;;  %2201 = vmatprep.mubr.msk.f32.mxu1 %vm277_vm0, %v1034_v27 }
 0x114   :  { %v508_v32 = vpop.f32.mrf.mxu0  ;;  %v845_v37 = vpop.f32.mrf.mxu1 }
 0x115   :  { %v1035_v34 = vmax.f32 %v809_v31, 0.0  ;;  %v509_v35 = vadd.f32 %v3219_v3, %v508_v32 }
 0x116   :  { %v510_v36 = vpop.f32.mrf.mxu0  ;;  %v848_v40 = vpop.f32.mrf.mxu1 }
 0x117   :  { %v814_v38 = vadd.f32 %v813_v62, %v509_v35  ;;  %2202 = vmatmul.mubr.msk.f32.gmra.mxu1 %vm277_vm0, %v1035_v34 }
 0x118   :  { %v513_v39 = vpop.f32.mrf.mxu0  ;;  %v850_v44 = vpop.f32.mrf.mxu1 }
 0x119   :  { %v1036_v41 = vmax.f32 %v814_v38, 0.0  ;;  %v514_v42 = vadd.f32 %v3219_v3, %v513_v39 }
 0x11a   :  { %v515_v43 = vpop.f32.mrf.mxu0  ;;  %v853_v47 = vpop.f32.mrf.mxu1 }
 0x11b   :  { %v819_v45 = vadd.f32 %v818_v1, %v514_v42  ;;  %2204 = vmatprep.mubr.msk.f32.mxu1 %vm277_vm0, %v1036_v41 }
 0x11c   :  { %v518_v46 = vpop.f32.mrf.mxu0  ;;  %v855_v51 = vpop.f32.mrf.mxu1 }
 0x11d   :  { %v1037_v48 = vmax.f32 %v819_v45, 0.0  ;;  %v519_v49 = vadd.f32 %v3219_v3, %v518_v46 }
 0x11e   :  { %v520_v50 = vpop.f32.mrf.mxu0  ;;  %v858_v54 = vpop.f32.mrf.mxu1 }
 0x11f   :  { %v824_v52 = vadd.f32 %v823_v6, %v519_v49  ;;  %2205 = vmatmul.mubr.msk.f32.gmra.mxu1 %vm277_vm0, %v1037_v48 }
 0x120   :  { %v523_v53 = vpop.f32.mrf.mxu0  ;;  %v860_v58 = vpop.f32.mrf.mxu1 }
 0x121   :  { %v1038_v55 = vmax.f32 %v824_v52, 0.0  ;;  %v524_v56 = vadd.f32 %v3219_v3, %v523_v53 }
 0x122   :  { %v525_v57 = vpop.f32.mrf.mxu0  ;;  %v863_v61 = vpop.f32.mrf.mxu1 }
 0x123   :  { %v829_v59 = vadd.f32 %v828_v12, %v524_v56  ;;  %2207 = vmatprep.mubr.msk.f32.mxu1 %vm277_vm0, %v1038_v55 }
 0x124   :  { %v528_v60 = vpop.f32.mrf.mxu0  ;;  %v865_v1 = vpop.f32.mrf.mxu1 }
 0x125   :  { %v1039_v62 = vmax.f32 %v829_v59, 0.0  ;;  %v529_v63 = vadd.f32 %v3219_v3, %v528_v60 }
 0x126   :  { %v530_v0 = vpop.f32.mrf.mxu0  ;;  %v868_v6 = vpop.f32.mrf.mxu1 }
 0x127   :  { %v834_v4 = vadd.f32 %v833_v19, %v529_v63  ;;  %2208 = vmatmul.mubr.msk.f32.gmra.mxu1 %vm277_vm0, %v1039_v62 }
 0x128   :  { %v533_v5 = vpop.f32.mrf.mxu0  ;;  %v870_v10 = vpop.f32.mrf.mxu1 }
 0x129   :  { %v1040_v7 = vmax.f32 %v834_v4, 0.0  ;;  %v534_v8 = vadd.f32 %v3219_v3, %v533_v5 }
 0x12a   :  { %v535_v9 = vpop.f32.mrf.mxu0  ;;  %v873_v13 = vpop.f32.mrf.mxu1 }
 0x12b   :  { %v839_v11 = vadd.f32 %v838_v26, %v534_v8  ;;  %2210 = vmatprep.mubr.msk.f32.mxu1 %vm277_vm0, %v1040_v7 }
 0x12c   :  { %v538_v12 = vpop.f32.mrf.mxu0  ;;  %v875_v17 = vpop.f32.mrf.mxu1 }
 0x12d   :  { %v1041_v14 = vmax.f32 %v839_v11, 0.0  ;;  %v539_v15 = vadd.f32 %v3219_v3, %v538_v12 }
 0x12e   :  { %v540_v16 = vpop.f32.mrf.mxu0  ;;  %v878_v20 = vpop.f32.mrf.mxu1 }
 0x12f   :  { %v844_v18 = vadd.f32 %v843_v33, %v539_v15  ;;  %2211 = vmatmul.mubr.msk.f32.gmra.mxu1 %vm277_vm0, %v1041_v14 }
 0x130   :  { %v543_v19 = vpop.f32.mrf.mxu0  ;;  %v880_v24 = vpop.f32.mrf.mxu1 }
 0x131   :  { %v1042_v21 = vmax.f32 %v844_v18, 0.0  ;;  %v544_v22 = vadd.f32 %v3219_v3, %v543_v19 }
 0x132   :  { %v545_v23 = vpop.f32.mrf.mxu0  ;;  %v883_v27 = vpop.f32.mrf.mxu1 }
 0x133   :  { %v849_v25 = vadd.f32 %v848_v40, %v544_v22  ;;  %2213 = vmatprep.mubr.msk.f32.mxu1 %vm277_vm0, %v1042_v21 }
 0x134   :  { %v548_v26 = vpop.f32.mrf.mxu0  ;;  %v885_v31 = vpop.f32.mrf.mxu1 }
 0x135   :  { %v1043_v28 = vmax.f32 %v849_v25, 0.0  ;;  %v549_v29 = vadd.f32 %v3219_v3, %v548_v26 }
 0x136   :  { %v550_v30 = vpop.f32.mrf.mxu0  ;;  %v888_v34 = vpop.f32.mrf.mxu1 }
 0x137   :  { %v854_v32 = vadd.f32 %v853_v47, %v549_v29  ;;  %2214 = vmatmul.mubr.msk.f32.gmra.mxu1 %vm277_vm0, %v1043_v28 }
 0x138   :  { %v553_v33 = vpop.f32.mrf.mxu0  ;;  %v890_v38 = vpop.f32.mrf.mxu1 }
 0x139   :  { %v1044_v35 = vmax.f32 %v854_v32, 0.0  ;;  %v554_v36 = vadd.f32 %v3219_v3, %v553_v33 }
 0x13a   :  { %v555_v37 = vpop.f32.mrf.mxu0  ;;  %v893_v41 = vpop.f32.mrf.mxu1 }
 0x13b   :  { %v859_v39 = vadd.f32 %v858_v54, %v554_v36  ;;  %2216 = vmatprep.mubr.msk.f32.mxu1 %vm277_vm0, %v1044_v35 }
 0x13c   :  { %v558_v40 = vpop.f32.mrf.mxu0  ;;  %v895_v45 = vpop.f32.mrf.mxu1 }
 0x13d   :  { %v1045_v42 = vmax.f32 %v859_v39, 0.0  ;;  %v559_v43 = vadd.f32 %v3219_v3, %v558_v40 }
 0x13e   :  { %v560_v44 = vpop.f32.mrf.mxu0  ;;  %v898_v48 = vpop.f32.mrf.mxu1 }
 0x13f   :  { %v864_v46 = vadd.f32 %v863_v61, %v559_v43  ;;  %2217 = vmatmul.mubr.msk.f32.gmra.mxu1 %vm277_vm0, %v1045_v42 }
 0x140   :  { %v563_v47 = vpop.f32.mrf.mxu0  ;;  %v900_v52 = vpop.f32.mrf.mxu1 }
 0x141   :  { %v1046_v49 = vmax.f32 %v864_v46, 0.0  ;;  %v564_v50 = vadd.f32 %v3219_v3, %v563_v47 }
 0x142   :  { %v565_v51 = vpop.f32.mrf.mxu0  ;;  %v903_v55 = vpop.f32.mrf.mxu1 }
 0x143   :  { %v869_v53 = vadd.f32 %v868_v6, %v564_v50  ;;  %2219 = vmatprep.mubr.msk.f32.mxu1 %vm277_vm0, %v1046_v49 }
 0x144   :  { %v568_v54 = vpop.f32.mrf.mxu0  ;;  %v905_v59 = vpop.f32.mrf.mxu1 }
 0x145   :  { %v1047_v56 = vmax.f32 %v869_v53, 0.0  ;;  %v569_v57 = vadd.f32 %v3219_v3, %v568_v54 }
 0x146   :  { %v570_v58 = vpop.f32.mrf.mxu0  ;;  %v908_v62 = vpop.f32.mrf.mxu1 }
 0x147   :  { %v874_v60 = vadd.f32 %v873_v13, %v569_v57  ;;  %2220 = vmatmul.mubr.msk.f32.gmra.mxu1 %vm277_vm0, %v1047_v56 }
 0x148   :  { %v573_v61 = vpop.f32.mrf.mxu0  ;;  %v910_v4 = vpop.f32.mrf.mxu1 }
 0x149   :  { %v1048_v63 = vmax.f32 %v874_v60, 0.0  ;;  %v574_v0 = vadd.f32 %v3219_v3, %v573_v61 }
 0x14a   :  { %v575_v1 = vpop.f32.mrf.mxu0  ;;  %v913_v7 = vpop.f32.mrf.mxu1 }
 0x14b   :  { %v879_v5 = vadd.f32 %v878_v20, %v574_v0  ;;  %2222 = vmatprep.mubr.msk.f32.mxu1 %vm277_vm0, %v1048_v63 }
 0x14c   :  { %v578_v6 = vpop.f32.mrf.mxu0  ;;  %v915_v11 = vpop.f32.mrf.mxu1 }
 0x14d   :  { %v1049_v8 = vmax.f32 %v879_v5, 0.0  ;;  %v579_v9 = vadd.f32 %v3219_v3, %v578_v6 }
 0x14e   :  { %v580_v10 = vpop.f32.mrf.mxu0  ;;  %v918_v14 = vpop.f32.mrf.mxu1 }
 0x14f   :  { %v884_v12 = vadd.f32 %v883_v27, %v579_v9  ;;  %2223 = vmatmul.mubr.msk.f32.gmra.mxu1 %vm277_vm0, %v1049_v8 }
 0x150   :  { %v583_v13 = vpop.f32.mrf.mxu0  ;;  %v920_v18 = vpop.f32.mrf.mxu1 }
 0x151   :  { %v1050_v15 = vmax.f32 %v884_v12, 0.0  ;;  %v584_v16 = vadd.f32 %v3219_v3, %v583_v13 }
 0x152   :  { %v585_v17 = vpop.f32.mrf.mxu0  ;;  %v923_v21 = vpop.f32.mrf.mxu1 }
 0x153   :  { %v889_v19 = vadd.f32 %v888_v34, %v584_v16  ;;  %2225 = vmatprep.mubr.msk.f32.mxu1 %vm277_vm0, %v1050_v15 }
 0x154   :  { %v588_v20 = vpop.f32.mrf.mxu0  ;;  %v925_v25 = vpop.f32.mrf.mxu1 }
 0x155   :  { %v1051_v22 = vmax.f32 %v889_v19, 0.0  ;;  %v589_v23 = vadd.f32 %v3219_v3, %v588_v20 }
 0x156   :  { %v590_v24 = vpop.f32.mrf.mxu0  ;;  %v928_v28 = vpop.f32.mrf.mxu1 }
 0x157   :  { %v894_v26 = vadd.f32 %v893_v41, %v589_v23  ;;  %2226 = vmatmul.mubr.msk.f32.gmra.mxu1 %vm277_vm0, %v1051_v22 }
 0x158   :  { %v593_v27 = vpop.f32.mrf.mxu0  ;;  %v930_v32 = vpop.f32.mrf.mxu1 }
 0x159   :  { %v1052_v29 = vmax.f32 %v894_v26, 0.0  ;;  %v594_v30 = vadd.f32 %v3219_v3, %v593_v27 }
 0x15a   :  { %v595_v31 = vpop.f32.mrf.mxu0  ;;  %v933_v35 = vpop.f32.mrf.mxu1 }
 0x15b   :  { %v899_v33 = vadd.f32 %v898_v48, %v594_v30  ;;  %2228 = vmatprep.mubr.msk.f32.mxu1 %vm277_vm0, %v1052_v29 }
 0x15c   :  { %v598_v34 = vpop.f32.mrf.mxu0  ;;  %v935_v39 = vpop.f32.mrf.mxu1 }
 0x15d   :  { %v1053_v36 = vmax.f32 %v899_v33, 0.0  ;;  %v599_v37 = vadd.f32 %v3219_v3, %v598_v34 }
 0x15e   :  { %v600_v38 = vpop.f32.mrf.mxu0  ;;  %v938_v42 = vpop.f32.mrf.mxu1 }
 0x15f   :  { %v904_v40 = vadd.f32 %v903_v55, %v599_v37  ;;  %2229 = vmatmul.mubr.msk.f32.gmra.mxu1 %vm277_vm0, %v1053_v36 }
 0x160   :  { %v603_v41 = vpop.f32.mrf.mxu0  ;;  %v940_v46 = vpop.f32.mrf.mxu1 }
 0x161   :  { %v1054_v43 = vmax.f32 %v904_v40, 0.0  ;;  %v604_v44 = vadd.f32 %v3219_v3, %v603_v41 }
 0x162   :  { %v605_v45 = vpop.f32.mrf.mxu0  ;;  %v943_v49 = vpop.f32.mrf.mxu1 }
 0x163   :  { %v909_v47 = vadd.f32 %v908_v62, %v604_v44  ;;  %2231 = vmatprep.mubr.msk.f32.mxu1 %vm277_vm0, %v1054_v43 }
 0x164   :  { %v608_v48 = vpop.f32.mrf.mxu0  ;;  %v945_v53 = vpop.f32.mrf.mxu1 }
 0x165   :  { %v1055_v50 = vmax.f32 %v909_v47, 0.0  ;;  %v609_v51 = vadd.f32 %v3219_v3, %v608_v48 }
 0x166   :  { %v610_v52 = vpop.f32.mrf.mxu0  ;;  %v948_v56 = vpop.f32.mrf.mxu1 }
 0x167   :  { %v914_v54 = vadd.f32 %v913_v7, %v609_v51  ;;  %2232 = vmatmul.mubr.msk.f32.gmra.mxu1 %vm277_vm0, %v1055_v50 }
 0x168   :  { %v613_v55 = vpop.f32.mrf.mxu0  ;;  %v950_v60 = vpop.f32.mrf.mxu1 }
 0x169   :  { %v1056_v57 = vmax.f32 %v914_v54, 0.0  ;;  %v614_v58 = vadd.f32 %v3219_v3, %v613_v55 }
 0x16a   :  { %v615_v59 = vpop.f32.mrf.mxu0  ;;  %v953_v63 = vpop.f32.mrf.mxu1 }
 0x16b   :  { %v919_v61 = vadd.f32 %v918_v14, %v614_v58  ;;  %2234 = vmatprep.mubr.msk.f32.mxu1 %vm277_vm0, %v1056_v57 }
 0x16c   :  { %v618_v62 = vpop.f32.mrf.mxu0  ;;  %v955_v5 = vpop.f32.mrf.mxu1 }
 0x16d   :  { %v1057_v0 = vmax.f32 %v919_v61, 0.0  ;;  %v619_v1 = vadd.f32 %v3219_v3, %v618_v62 }
 0x16e   :  { %v620_v4 = vpop.f32.mrf.mxu0  ;;  %v958_v8 = vpop.f32.mrf.mxu1 }
 0x16f   :  { %v924_v6 = vadd.f32 %v923_v21, %v619_v1  ;;  %2235 = vmatmul.mubr.msk.f32.gmra.mxu1 %vm277_vm0, %v1057_v0 }
 0x170   :  { %v623_v7 = vpop.f32.mrf.mxu0  ;;  %v960_v12 = vpop.f32.mrf.mxu1 }
 0x171   :  { %v1058_v9 = vmax.f32 %v924_v6, 0.0  ;;  %v624_v10 = vadd.f32 %v3219_v3, %v623_v7 }
 0x172   :  { %v625_v11 = vpop.f32.mrf.mxu0  ;;  %v963_v15 = vpop.f32.mrf.mxu1 }
 0x173   :  { %v929_v13 = vadd.f32 %v928_v28, %v624_v10  ;;  %2237 = vmatprep.mubr.msk.f32.mxu1 %vm277_vm0, %v1058_v9 }
 0x174   :  { %v628_v14 = vpop.f32.mrf.mxu0  ;;  %v965_v19 = vpop.f32.mrf.mxu1 }
 0x175   :  { %v1059_v16 = vmax.f32 %v929_v13, 0.0  ;;  %v629_v17 = vadd.f32 %v3219_v3, %v628_v14 }
 0x176   :  { %v630_v18 = vpop.f32.mrf.mxu0  ;;  %v968_v22 = vpop.f32.mrf.mxu1 }
 0x177   :  { %v934_v20 = vadd.f32 %v933_v35, %v629_v17  ;;  %2238 = vmatmul.mubr.msk.f32.gmra.mxu1 %vm277_vm0, %v1059_v16 }
 0x178   :  { %v633_v21 = vpop.f32.mrf.mxu0  ;;  %v970_v26 = vpop.f32.mrf.mxu1 }
 0x179   :  { %v1060_v23 = vmax.f32 %v934_v20, 0.0  ;;  %v634_v24 = vadd.f32 %v3219_v3, %v633_v21 }
 0x17a   :  { %v635_v25 = vpop.f32.mrf.mxu0  ;;  %v973_v29 = vpop.f32.mrf.mxu1 }
 0x17b   :  { %v939_v27 = vadd.f32 %v938_v42, %v634_v24  ;;  %2240 = vmatprep.mubr.msk.f32.mxu1 %vm277_vm0, %v1060_v23 }
 0x17c   :  { %v638_v28 = vpop.f32.mrf.mxu0  ;;  %v975_v33 = vpop.f32.mrf.mxu1 }
 0x17d   :  { %v1061_v30 = vmax.f32 %v939_v27, 0.0  ;;  %v639_v31 = vadd.f32 %v3219_v3, %v638_v28 }
 0x17e   :  { %v640_v32 = vpop.f32.mrf.mxu0  ;;  %v978_v36 = vpop.f32.mrf.mxu1 }
 0x17f   :  { %v944_v34 = vadd.f32 %v943_v49, %v639_v31  ;;  %2241 = vmatmul.mubr.msk.f32.gmra.mxu1 %vm277_vm0, %v1061_v30 }
 0x180   :  { %v643_v35 = vpop.f32.mrf.mxu0  ;;  %v980_v40 = vpop.f32.mrf.mxu1 }
 0x181   :  { %v1062_v37 = vmax.f32 %v944_v34, 0.0  ;;  %v644_v38 = vadd.f32 %v3219_v3, %v643_v35 }
 0x182   :  { %v645_v39 = vpop.f32.mrf.mxu0  ;;  %v983_v43 = vpop.f32.mrf.mxu1 }
 0x183   :  { %v949_v41 = vadd.f32 %v948_v56, %v644_v38  ;;  %2243 = vmatprep.mubr.msk.f32.mxu1 %vm277_vm0, %v1062_v37 }
 0x184   :  { %v648_v42 = vpop.f32.mrf.mxu0  ;;  %v985_v47 = vpop.f32.mrf.mxu1 }
 0x185   :  { %v1063_v44 = vmax.f32 %v949_v41, 0.0  ;;  %v649_v45 = vadd.f32 %v3219_v3, %v648_v42 }
 0x186   :  { %v650_v46 = vpop.f32.mrf.mxu0  ;;  %v988_v50 = vpop.f32.mrf.mxu1 }
 0x187   :  { %v954_v48 = vadd.f32 %v953_v63, %v649_v45  ;;  %2244 = vmatmul.mubr.msk.f32.gmra.mxu1 %vm277_vm0, %v1063_v44 }
 0x188   :  { %v653_v49 = vpop.f32.mrf.mxu0  ;;  %v990_v54 = vpop.f32.mrf.mxu1 }
 0x189   :  { %v1064_v51 = vmax.f32 %v954_v48, 0.0  ;;  %v654_v52 = vadd.f32 %v3219_v3, %v653_v49 }
 0x18a   :  { %v655_v53 = vpop.f32.mrf.mxu0  ;;  %v993_v57 = vpop.f32.mrf.mxu1 }
 0x18b   :  { %v959_v55 = vadd.f32 %v958_v8, %v654_v52  ;;  %2246 = vmatprep.mubr.msk.f32.mxu1 %vm277_vm0, %v1064_v51 }
 0x18c   :  { %v658_v56 = vpop.f32.mrf.mxu0  ;;  %v995_v61 = vpop.f32.mrf.mxu1 }
 0x18d   :  { %v1065_v58 = vmax.f32 %v959_v55, 0.0  ;;  %v659_v59 = vadd.f32 %v3219_v3, %v658_v56 }
 0x18e   :  { %v660_v60 = vpop.f32.mrf.mxu0  ;;  %v998_v0 = vpop.f32.mrf.mxu1 }
 0x18f   :  { %v964_v62 = vadd.f32 %v963_v15, %v659_v59  ;;  %2247 = vmatmul.mubr.msk.f32.gmra.mxu1 %vm277_vm0, %v1065_v58 }
 0x190   :  { %v663_v63 = vpop.f32.mrf.mxu0  ;;  %v1000_v6 = vpop.f32.mrf.mxu1 }
 0x191   :  { %v1066_v1 = vmax.f32 %v964_v62, 0.0  ;;  %v664_v4 = vadd.f32 %v3219_v3, %v663_v63 }
 0x192   :  { %v665_v5 = vpop.f32.mrf.mxu0  ;;  %v1003_v9 = vpop.f32.mrf.mxu1 }
 0x193   :  { %v969_v7 = vadd.f32 %v968_v22, %v664_v4  ;;  %2249 = vmatprep.mubr.msk.f32.mxu1 %vm277_vm0, %v1066_v1 }
 0x194   :  { %v668_v8 = vpop.f32.mrf.mxu0  ;;  %v1005_v13 = vpop.f32.mrf.mxu1 }
 0x195   :  { %v1067_v10 = vmax.f32 %v969_v7, 0.0  ;;  %v669_v11 = vadd.f32 %v3219_v3, %v668_v8 }
 0x196   :  { %v670_v12 = vpop.f32.mrf.mxu0  ;;  %v1008_v16 = vpop.f32.mrf.mxu1 }
 0x197   :  { %v974_v14 = vadd.f32 %v973_v29, %v669_v11  ;;  %2250 = vmatmul.mubr.msk.f32.gmra.mxu1 %vm277_vm0, %v1067_v10 }
 0x198   :  { %v673_v15 = vpop.f32.mrf.mxu0  ;;  %v1010_v20 = vpop.f32.mrf.mxu1 }
 0x199   :  { %v1068_v17 = vmax.f32 %v974_v14, 0.0  ;;  %v674_v18 = vadd.f32 %v3219_v3, %v673_v15 }
 0x19a   :  { %v675_v19 = vpop.f32.mrf.mxu0  ;;  %v1013_v23 = vpop.f32.mrf.mxu1 }
 0x19b   :  { %v979_v21 = vadd.f32 %v978_v36, %v674_v18  ;;  %2252 = vmatprep.mubr.msk.f32.mxu1 %vm277_vm0, %v1068_v17 }
 0x19c   :  { %v678_v22 = vpop.f32.mrf.mxu0  ;;  %v1015_v27 = vpop.f32.mrf.mxu1 }
 0x19d   :  { %v1069_v24 = vmax.f32 %v979_v21, 0.0  ;;  %v679_v25 = vadd.f32 %v3219_v3, %v678_v22 }
 0x19e   :  { %v680_v26 = vpop.f32.mrf.mxu0  ;;  %v1018_v30 = vpop.f32.mrf.mxu1 }
 0x19f   :  { %v984_v28 = vadd.f32 %v983_v43, %v679_v25  ;;  %2253 = vmatmul.mubr.msk.f32.gmra.mxu1 %vm277_vm0, %v1069_v24 }
 0x1a0   :  { %v683_v29 = vpop.f32.mrf.mxu0  ;;  %v1020_v34 = vpop.f32.mrf.mxu1 }
 0x1a1   :  { %v1070_v31 = vmax.f32 %v984_v28, 0.0  ;;  %v684_v32 = vadd.f32 %v3219_v3, %v683_v29  ;;  %v3340_v28 = vld [vmem:[%s3529_s5] sm:$0x1] }
 0x1a2   :  { %v685_v33 = vpop.f32.mrf.mxu0  ;;  %v1023_v37 = vpop.f32.mrf.mxu1  ;;  %2177 = vmatprep.mubr.msk.f32.mxu0 %vm277_vm0, %v3340_v28 }
 0x1a3   :  { %v989_v35 = vadd.f32 %v988_v50, %v684_v32  ;;  %2255 = vmatprep.mubr.msk.f32.mxu1 %vm277_vm0, %v1070_v31 }
 0x1a4   :  { %v688_v36 = vpop.f32.mrf.mxu0  ;;  %v1025_v41 = vpop.f32.mrf.mxu1 }
 0x1a5   :  { %v1071_v38 = vmax.f32 %v989_v35, 0.0  ;;  %v689_v39 = vadd.f32 %v3219_v3, %v688_v36 }
 0x1a6   :  { %v690_v40 = vpop.f32.mrf.mxu0  ;;  %v1028_v44 = vpop.f32.mrf.mxu1 }
 0x1a7   :  { %v994_v42 = vadd.f32 %v993_v57, %v689_v39  ;;  %2256 = vmatmul.mubr.msk.f32.gmra.mxu1 %vm277_vm0, %v1071_v38 }
 0x1a8   :  { %v693_v43 = vpop.f32.mrf.mxu0  ;;  %v1030_v48 = vpop.f32.mrf.mxu1 }
 0x1a9   :  { %v1072_v45 = vmax.f32 %v994_v42, 0.0  ;;  %v694_v46 = vadd.f32 %v3219_v3, %v693_v43 }
 0x1aa   :  { %v695_v47 = vpop.f32.mrf.mxu0 }
 0x1ab   :  { %v999_v49 = vadd.f32 %v998_v0, %v694_v46  ;;  %2258 = vmatprep.mubr.msk.f32.mxu1 %vm277_vm0, %v1072_v45 }
 0x1ac   :  { %v698_v50 = vpop.f32.mrf.mxu0 }
 0x1ad   :  { %v1073_v51 = vmax.f32 %v999_v49, 0.0  ;;  %v699_v52 = vadd.f32 %v3219_v3, %v698_v50  ;;  %v3361_v49 = vld [vmem:[%s3528_s4] ss:$0 sm:$0xff]  ;;  %s2349_s4 = smov [#allocation3]  }
 0x1ae   :  { %v700_v53 = vpop.f32.mrf.mxu0  ;;  %s1940_s11 = sshll.u32 %s2349_s4, 4  ;;  %s1941_s11 = int_to_ptr.vmem [resolvable:$true] %s1940_s11 }
 0x1af   :  { %v1004_v54 = vadd.f32 %v1003_v9, %v699_v52  ;;  %2259 = vmatmul.mubr.msk.f32.gmra.mxu1 %vm277_vm0, %v1073_v51  ;;  %s2323_s12 = scalar_lea.vmem %s1941_s11, 48  ;;  %s2327_s13 = scalar_lea.vmem %s1941_s11, 64 }
 0x1b0   :  { %v703_v55 = vpop.f32.mrf.mxu0  ;;  %p2324_p0 = scmp.ne.s32.totalorder %s1941_s11, %s2323_s12  ;;  %p2328_p1 = scmp.lt.s32.totalorder %s1941_s11, %s1941_s11 }
 0x1b1   :  { %v1074_v56 = vmax.f32 %v1004_v54, 0.0  ;;  %v704_v57 = vadd.f32 %v3219_v3, %v703_v55  ;;  %p2329_p2 = scmp.lt.s32.totalorder %s2327_s13, %s2323_s12 }
 0x1b2   :  { %v705_v58 = vpop.f32.mrf.mxu0 }
 0x1b3   :  { %v1009_v59 = vadd.f32 %v1008_v16, %v704_v57  ;;  %2261 = vmatprep.mubr.msk.f32.mxu1 %vm277_vm0, %v1074_v56  ;;  %p2330_p3 = por %p2329_p2, %p2328_p1 }
 0x1b4   :  { %v708_v60 = vpop.f32.mrf.mxu0 }
 0x1b5   :  { %v1075_v61 = vmax.f32 %v1009_v59, 0.0  ;;  %v709_v62 = vadd.f32 %v3219_v3, %v708_v60  ;;  %v1586_v60 = vld [vmem:[#allocation2] sm:$0x1]  ;;  %p2331_p4 = pnand %p2330_p3, %p2324_p0 }
 0x1b6   :  { %v710_v63 = vpop.f32.mrf.mxu0 }
 0x1b7   :  { %v1014_v0 = vadd.f32 %v1013_v23, %v709_v62  ;;  %2262 = vmatmul.mubr.msk.f32.gmra.mxu1 %vm277_vm0, %v1075_v61  ;;  %v2346_v61 = vmov 0  }
 0x1b8   :  { %v713_v1 = vpop.f32.mrf.mxu0  ;;  %2310 = vset.pattern.permute.xlu0 %v2346_v61 }
 0x1b9   :  { %v1076_v4 = vmax.f32 %v1014_v0, 0.0  ;;  %v714_v5 = vadd.f32 %v3219_v3, %v713_v1  ;;  %1589 = vperm.xlu0 %2310, %v1586_v60  }
 0x1ba   :  { %v715_v6 = vpop.f32.mrf.mxu0 }
 0x1bb   :  { %v1019_v7 = vadd.f32 %v1018_v30, %v714_v5  ;;  %2264 = vmatprep.mubr.msk.f32.mxu1 %vm277_vm0, %v1076_v4 }
 0x1bc   :  { %v718_v8 = vpop.f32.mrf.mxu0 }
 0x1bd   :  { %v1077_v9 = vmax.f32 %v1019_v7, 0.0  ;;  %v719_v10 = vadd.f32 %v3219_v3, %v718_v8 }
 0x1be   :  { %v720_v11 = vpop.f32.mrf.mxu0 }
 0x1bf   :  { %v1024_v12 = vadd.f32 %v1023_v37, %v719_v10  ;;  %2265 = vmatmul.mubr.msk.f32.gmra.mxu1 %vm277_vm0, %v1077_v9 }
 0x1c0   :  { %v723_v13 = vpop.f32.mrf.mxu0 }
 0x1c1   :  { %v1078_v14 = vmax.f32 %v1024_v12, 0.0  ;;  %v724_v15 = vadd.f32 %v3219_v3, %v723_v13 }
 0x1c2   :  { %v725_v16 = vpop.f32.mrf.mxu0 }
 0x1c3   :  { %v1029_v17 = vadd.f32 %v1028_v44, %v724_v15  ;;  %2267 = vmatprep.mubr.msk.f32.mxu1 %vm277_vm0, %v1078_v14 }
 0x1c5   :  { %v1079_v18 = vmax.f32 %v1029_v17, 0.0 }
 0x1c7   :  { %2268 = vmatmul.mubr.msk.f32.gmra.mxu1 %vm277_vm0, %v1079_v18 }
 0x1cf   :  { %v3317_v19 = vpop.f32.mrf.mxu1 }
 0x1d1   :  { %v3319_v20 = vpop.f32.mrf.mxu1 }
 0x1d7   :  { %v3321_v21 = vpop.f32.mrf.mxu1 }
 0x1d9   :  { %v3323_v22 = vpop.f32.mrf.mxu1 }
 0x1df   :  { %v3325_v23 = vpop.f32.mrf.mxu1 }
 0x1e1   :  { %v3327_v24 = vpop.f32.mrf.mxu1 }
 0x1e7   :  { %v3329_v3 = vpop.f32.mrf.mxu1 }
 0x1e9   :  { %v3331_v25 = vpop.f32.mrf.mxu1 }
 0x1ef   :  { %v3333_v26 = vpop.f32.mrf.mxu1 }
 0x1f0   :  { %v1344_v17 = vadd.f32 %v3333_v26, %v3361_v49  ;;  %v1334_v26 = vadd.f32 %v3329_v3, %v3361_v49 }
 0x1f1   :  { %v3335_v27 = vpop.f32.mrf.mxu1 }
 0x1f7   :  { %v2215_v29 = vpop.f32.mrf.mxu1 }
 0x1f8   :  { %v1354_v8 = vadd.f32 %v2215_v29, %v3361_v49 }
 0x1f9   :  { %v1348_v30 = vpop.f32.mrf.mxu1 }
 0x1fa   :  { %v1548_v12 = vmax.f32 %v1354_v8, 0.0  ;;  %v1349_v13 = vadd.f32 %v3361_v49, %v1348_v30  ;;  %v1546_v30 = vmax.f32 %v1344_v17, 0.0  ;;  %v1299_v8 = vadd.f32 %v3361_v49, %v3319_v20 }
 0x1fc   :  { %v1547_v18 = vmax.f32 %v1349_v13, 0.0 }
 0x1ff   :  { %v2218_v31 = vpop.f32.mrf.mxu1 }
 0x200   :  { %v1364_v62 = vadd.f32 %v2218_v31, %v3361_v49 }
 0x201   :  { %v1358_v32 = vpop.f32.mrf.mxu1 }
 0x202   :  { %v1550_v4 = vmax.f32 %v1364_v62, 0.0  ;;  %v1359_v5 = vadd.f32 %v3361_v49, %v1358_v32 }
 0x204   :  { %v1549_v9 = vmax.f32 %v1359_v5, 0.0 }
 0x207   :  { %v2221_v33 = vpop.f32.mrf.mxu1 }
 0x208   :  { %v1374_v50 = vadd.f32 %v2221_v33, %v3361_v49  ;;  %v1339_v33 = vadd.f32 %v3361_v49, %v3335_v27 }
 0x209   :  { %v1368_v34 = vpop.f32.mrf.mxu1 }
 0x20a   :  { %v1552_v56 = vmax.f32 %v1374_v50, 0.0  ;;  %v1369_v57 = vadd.f32 %v3361_v49, %v1368_v34  ;;  %v1329_v50 = vadd.f32 %v3361_v49, %v3331_v25 }
 0x20c   :  { %v1551_v63 = vmax.f32 %v1369_v57, 0.0 }
 0x20f   :  { %v3344_v35 = vpop.f32.mrf.mxu1 }
 0x211   :  { %v3346_v36 = vpop.f32.mrf.mxu1 }
 0x217   :  { %v3348_v37 = vpop.f32.mrf.mxu1 }
 0x219   :  { %v3350_v38 = vpop.f32.mrf.mxu1 }
 0x21a   :  { %v1389_v62 = vadd.f32 %v3361_v49, %v3350_v38 }
 0x21f   :  { %v3352_v39 = vpop.f32.mrf.mxu1 }
 0x220   :  { %v1404_v3 = vadd.f32 %v3352_v39, %v3361_v49 }
 0x221   :  { %v3354_v40 = vpop.f32.mrf.mxu1 }
 0x222   :  { %v1399_v25 = vadd.f32 %v3361_v49, %v3354_v40  ;;  %v1314_v40 = vadd.f32 %v3321_v21, %v3361_v49  ;;  %v1304_v21 = vadd.f32 %v3317_v19, %v3361_v49  ;;  %v1537_v19 = vmax.f32 %v1299_v8, 0.0 }
 0x227   :  { %v2233_v41 = vpop.f32.mrf.mxu1 }
 0x229   :  { %v3356_v42 = vpop.f32.mrf.mxu1 }
 0x22f   :  { %v2236_v43 = vpop.f32.mrf.mxu1 }
 0x230   :  { %v1424_v14 = vadd.f32 %v2236_v43, %v3361_v49  ;;  %v1414_v43 = vadd.f32 %v2233_v41, %v3361_v49  ;;  %v1544_v41 = vmax.f32 %v1334_v26, 0.0 }
 0x231   :  { %v1418_v44 = vpop.f32.mrf.mxu1 }
 0x232   :  { %v1562_v29 = vmax.f32 %v1424_v14, 0.0  ;;  %v1419_v31 = vadd.f32 %v3361_v49, %v1418_v44  ;;  %v1545_v44 = vmax.f32 %v1339_v33, 0.0 }
 0x237   :  { %v2239_v45 = vpop.f32.mrf.mxu1 }
 0x238   :  { %v1434_v6 = vadd.f32 %v2239_v45, %v3361_v49  ;;  %v1561_v45 = vmax.f32 %v1419_v31, 0.0 }
 0x239   :  { %v1428_v46 = vpop.f32.mrf.mxu1 }
 0x23a   :  { %v1564_v10 = vmax.f32 %v1434_v6, 0.0  ;;  %v1429_v11 = vadd.f32 %v3361_v49, %v1428_v46 }
 0x23c   :  { %v1563_v15 = vmax.f32 %v1429_v11, 0.0 }
 0x23f   :  { %v2242_v47 = vpop.f32.mrf.mxu1 }
 0x240   :  { %v1444_v58 = vadd.f32 %v2242_v47, %v3361_v49  ;;  %v1560_v47 = vmax.f32 %v1414_v43, 0.0 }
 0x241   :  { %v1438_v48 = vpop.f32.mrf.mxu1 }
 0x242   :  { %v1566_v0 = vmax.f32 %v1444_v58, 0.0  ;;  %v1439_v1 = vadd.f32 %v3361_v49, %v1438_v48  ;;  %v1409_v48 = vadd.f32 %v3361_v49, %v3356_v42  ;;  %v1324_v42 = vadd.f32 %v3325_v23, %v3361_v49 }
 0x243   :  { %v1394_v23 = vadd.f32 %v3348_v37, %v3361_v49  ;;  %v1557_v58 = vmax.f32 %v1399_v25, 0.0  ;;  %v1540_v37 = vmax.f32 %v1314_v40, 0.0 }
 0x244   :  { %v1565_v7 = vmax.f32 %v1439_v1, 0.0  ;;  %v1542_v39 = vmax.f32 %v1324_v42, 0.0  ;;  %v1384_v1 = vadd.f32 %v3344_v35, %v3361_v49  ;;  %v1538_v35 = vmax.f32 %v1304_v21, 0.0 }
 0x245   :  { %v1556_v61 = vmax.f32 %v1394_v23, 0.0 }
 0x246   :  { %v1554_v6 = vmax.f32 %v1384_v1, 0.0 }
 0x247   :  { %v2245_v51 = vpop.f32.mrf.mxu1 }
 0x248   :  { %v1454_v52 = vadd.f32 %v2245_v51, %v3361_v49  ;;  %v1559_v51 = vmax.f32 %v1409_v48, 0.0 }
 0x249   :  { %v1448_v53 = vpop.f32.mrf.mxu1 }
 0x24a   :  { %v1568_v54 = vmax.f32 %v1454_v52, 0.0  ;;  %v1449_v55 = vadd.f32 %v3361_v49, %v1448_v53  ;;  %v1543_v53 = vmax.f32 %v1329_v50, 0.0 }
 0x24c   :  { %v1567_v59 = vmax.f32 %v1449_v55, 0.0  ;;  %2145 = vmatprep.subr.msk.mxu0 %vm277_vm0, %v1568_v54  ;;  %v1558_v55 = vmax.f32 %v1404_v3, 0.0 }
 0x24d   :  { %2146 = vmatpush3.xpose.msk.msra.mxu0 %vm277_vm0, %v1552_v56  ;;  %v1319_v56 = vadd.f32 %v3361_v49, %v3327_v24 }
 0x24e   :  { %2147 = vmatprep.subr.msk.mxu0 %vm277_vm0, %v1567_v59 }
 0x24f   :  { %v3386_v16 = vpop.f32.mrf.mxu1  ;;  %v1541_v60 = vmax.f32 %v1319_v56, 0.0 }
 0x251   :  { %2148 = vmatpush3.xpose.msk.msra.mxu0 %vm277_vm0, %v1551_v63  ;;  %v3393_v32 = vpop.f32.mrf.mxu1  ;;  %v1309_v63 = vadd.f32 %v3361_v49, %v3323_v22 }
 0x252   :  { %2149 = vmatprep.subr.msk.mxu0 %vm277_vm0, %v1566_v0  ;;  %v1459_v56 = vadd.f32 %v3361_v49, %v3393_v32 }
 0x253   :  { %v1539_v38 = vmax.f32 %v1309_v63, 0.0 }
 0x255   :  { %2150 = vmatpush3.xpose.msk.msra.mxu0 %vm277_vm0, %v1550_v4  ;;  %v1555_v4 = vmax.f32 %v1389_v62, 0.0 }
 0x256   :  { %2151 = vmatprep.subr.msk.mxu0 %vm277_vm0, %v1565_v7  ;;  %v1379_v7 = vadd.f32 %v3361_v49, %v3346_v36 }
 0x257   :  { %v3398_v34 = vpop.f32.mrf.mxu1 }
 0x259   :  { %2152 = vmatpush3.xpose.msk.msra.mxu0 %vm277_vm0, %v1549_v9  ;;  %v3405_v46 = vpop.f32.mrf.mxu1  ;;  %v1553_v9 = vmax.f32 %v1379_v7, 0.0 }
 0x25a   :  { %2153 = vmatprep.subr.msk.mxu0 %vm277_vm0, %v1564_v10  ;;  %v1469_v25 = vadd.f32 %v3361_v49, %v3405_v46  ;;  %v1569_v46 = vmax.f32 %v1459_v56, 0.0 }
 0x25d   :  { %2154 = vmatpush3.xpose.msk.msra.mxu0 %vm277_vm0, %v1548_v12 }
 0x25e   :  { %2155 = vmatprep.subr.msk.mxu0 %vm277_vm0, %v1563_v15 }
 0x25f   :  { %v3410_v27 = vpop.f32.mrf.mxu1 }
 0x260   :  { %v1484_v3 = vadd.f32 %v3410_v27, %v3361_v49 }
 0x261   :  { %2156 = vmatpush3.xpose.msk.msra.mxu0 %vm277_vm0, %v1547_v18  ;;  %v3418_v52 = vpop.f32.mrf.mxu1 }
 0x262   :  { %2157 = vmatprep.subr.msk.mxu0 %vm277_vm0, %v1562_v29  ;;  %v1574_v42 = vmax.f32 %v1484_v3, 0.0 }
 0x265   :  { %2158 = vmatpush3.xpose.msk.msra.mxu0 %vm277_vm0, %v1546_v30 }
 0x266   :  { %2159 = vmatprep.subr.msk.mxu0 %vm277_vm0, %v1561_v45 }
 0x267   :  { %v3423_v54 = vpop.f32.mrf.mxu1 }
 0x269   :  { %2160 = vmatpush3.xpose.msk.msra.mxu0 %vm277_vm0, %v1545_v44  ;;  %v3431_v57 = vpop.f32.mrf.mxu1 }
 0x26a   :  { %2161 = vmatprep.subr.msk.mxu0 %vm277_vm0, %v1560_v47  ;;  %v1494_v47 = vadd.f32 %v3423_v54, %v3361_v49  ;;  %v1489_v50 = vadd.f32 %v3361_v49, %v3431_v57  ;;  %v1474_v54 = vadd.f32 %v3398_v34, %v3361_v49 }
 0x26c   :  { %v1572_v27 = vmax.f32 %v1474_v54, 0.0 }
 0x26d   :  { %2162 = vmatpush3.xpose.msk.msra.mxu0 %vm277_vm0, %v1544_v41  ;;  %v1576_v41 = vmax.f32 %v1494_v47, 0.0 }
 0x26e   :  { %2163 = vmatprep.subr.msk.mxu0 %vm277_vm0, %v1559_v51  ;;  %v1575_v51 = vmax.f32 %v1489_v50, 0.0 }
 0x26f   :  { %v2260_v59 = vpop.f32.mrf.mxu1 }
 0x270   :  { %v1504_v43 = vadd.f32 %v2260_v59, %v3361_v49 }
 0x271   :  { %2164 = vmatpush3.xpose.msk.msra.mxu0 %vm277_vm0, %v1543_v53  ;;  %v1498_v24 = vpop.f32.mrf.mxu1  ;;  %v1479_v53 = vadd.f32 %v3361_v49, %v3418_v52  ;;  %v1464_v52 = vadd.f32 %v3386_v16, %v3361_v49  ;;  %v1592_v16 = vlaneseq }
 0x272   :  { %2165 = vmatprep.subr.msk.mxu0 %vm277_vm0, %v1558_v55  ;;  %v1578_v26 = vmax.f32 %v1504_v43, 0.0  ;;  %v1499_v44 = vadd.f32 %v3361_v49, %v1498_v24 }
 0x273   :  { %v1573_v55 = vmax.f32 %v1479_v53, 0.0  ;;  %v1570_v34 = vmax.f32 %v1464_v52, 0.0  ;;  %v1593_v57 = vshrl.u32 %v1592_v16, 7  ;;  %vm1931_vm2 = vcmp.lt.s32.totalorder %v1592_v16, 384 }
 0x274   :  { %v1577_v48 = vmax.f32 %v1499_v44, 0.0 }
 0x275   :  { %2166 = vmatpush3.xpose.msk.msra.mxu0 %vm277_vm0, %v1542_v39  ;;  %v1571_v39 = vmax.f32 %v1469_v25, 0.0  ;;  %v1594_v23 = vsub.s32 0, %v1593_v57 }
 0x276   :  { %2167 = vmatprep.subr.msk.mxu0 %vm277_vm0, %v1557_v58  ;;  %v1590_v58 = vpop.permute.xlu0 %1589 }
 0x277   :  { %v2263_v0 = vpop.f32.mrf.mxu1  ;;  %v1595_v40 = vrot.slane %v1590_v58, %v1594_v23 }
 0x278   :  { %v1514_v29 = vadd.f32 %v2263_v0, %v3361_v49 }
 0x279   :  { %2168 = vmatpush3.xpose.msk.msra.mxu0 %vm277_vm0, %v1541_v60  ;;  %v1508_v5 = vpop.f32.mrf.mxu1 }
 0x27a   :  { %2169 = vmatprep.subr.msk.mxu0 %vm277_vm0, %v1556_v61  ;;  %v1580_v30 = vmax.f32 %v1514_v29, 0.0  ;;  %v1509_v33 = vadd.f32 %v3361_v49, %v1508_v5 }
 0x27c   :  { %v1579_v45 = vmax.f32 %v1509_v33, 0.0 }
 0x27d   :  { %2170 = vmatpush3.xpose.msk.msra.mxu0 %vm277_vm0, %v1540_v37 }
 0x27e   :  { %2171 = vmatprep.subr.msk.mxu0 %vm277_vm0, %v1555_v4 }
 0x27f   :  { %v2266_v22 = vpop.f32.mrf.mxu1 }
 0x280   :  { %v1524_v20 = vadd.f32 %v2266_v22, %v3361_v49  ;;  %v2348_v22 = vmov 1966171168  }
 0x281   :  { %2172 = vmatpush3.xpose.msk.msra.mxu0 %vm277_vm0, %v1539_v38  ;;  %v1518_v10 = vpop.f32.mrf.mxu1 }
 0x282   :  { %2173 = vmatprep.subr.msk.mxu0 %vm277_vm0, %v1554_v6  ;;  %v1582_v17 = vmax.f32 %v1524_v20, 0.0  ;;  %v1519_v18 = vadd.f32 %v3361_v49, %v1518_v10 }
 0x284   :  { %v1581_v31 = vmax.f32 %v1519_v18, 0.0 }
 0x285   :  { %2174 = vmatpush3.xpose.msk.msra.mxu0 %vm277_vm0, %v1538_v35  ;;  %v1907_v35 = vunpack.c.l.s4 %v2348_v22 }
 0x286   :  { %2175 = vmatprep.subr.msk.mxu0 %vm277_vm0, %v1553_v9 }
 0x287   :  { %v2269_v11 = vpop.f32.mrf.mxu1  ;;  %v1908_v9 = vunpack.c.0.s8 %v1907_v35 }
 0x288   :  { %v1534_v12 = vadd.f32 %v2269_v11, %v3361_v49 }
 0x289   :  { %2176 = vmatpush3.xpose.msk.msra.mxu0 %vm277_vm0, %v1537_v19  ;;  %v1528_v36 = vpop.f32.mrf.mxu1  ;;  %v1911_v19 = vsub.s32 %v1908_v9, %v1593_v57 }
 0x28a   :  { %v1584_v13 = vmax.f32 %v1534_v12, 0.0  ;;  %2270 = vmatprep.subr.mxu0 %v2345_v2  ;;  %v1529_v14 = vadd.f32 %v3361_v49, %v1528_v36 }
 0x28c   :  { %2178 = vmatmul.mubr.msk.f32.vlgmr.msra.gmra.mxu0 %vm277_vm0, %v3340_v28  ;;  %v1583_v15 = vmax.f32 %v1529_v14, 0.0 }
 0x28d   :  { %2271 = vmatpush3.xpose.msk.msra.mxu0 %vm277_vm0, %v1584_v13  ;;  %2302 = vmatprep.mubr.msk.f32.mxu0 %vm2347_vm1, %v2345_v2 }
 0x28e   :  { %2272 = vmatprep.subr.mxu0 %v2345_v2 }
 0x291   :  { %2273 = vmatpush3.xpose.msk.msra.mxu0 %vm277_vm0, %v1583_v15 }
 0x292   :  { %2274 = vmatprep.subr.mxu0 %v2345_v2 }
 0x295   :  { %2275 = vmatpush3.xpose.msk.msra.mxu0 %vm277_vm0, %v1582_v17 }
 0x296   :  { %2276 = vmatprep.subr.mxu0 %v2345_v2 }
 0x299   :  { %2277 = vmatpush3.xpose.msk.msra.mxu0 %vm277_vm0, %v1581_v31 }
 0x29a   :  { %2278 = vmatprep.subr.mxu0 %v2345_v2 }
 0x29d   :  { %2279 = vmatpush3.xpose.msk.msra.mxu0 %vm277_vm0, %v1580_v30 }
 0x29e   :  { %2280 = vmatprep.subr.mxu0 %v2345_v2 }
 0x2a1   :  { %2281 = vmatpush3.xpose.msk.msra.mxu0 %vm277_vm0, %v1579_v45 }
 0x2a2   :  { %2282 = vmatprep.subr.mxu0 %v2345_v2 }
 0x2a5   :  { %2283 = vmatpush3.xpose.msk.msra.mxu0 %vm277_vm0, %v1578_v26 }
 0x2a6   :  { %2284 = vmatprep.subr.mxu0 %v2345_v2 }
 0x2a9   :  { %2285 = vmatpush3.xpose.msk.msra.mxu0 %vm277_vm0, %v1577_v48 }
 0x2aa   :  { %2286 = vmatprep.subr.mxu0 %v2345_v2 }
 0x2ad   :  { %2287 = vmatpush3.xpose.msk.msra.mxu0 %vm277_vm0, %v1576_v41 }
 0x2ae   :  { %2288 = vmatprep.subr.mxu0 %v2345_v2 }
 0x2b1   :  { %2289 = vmatpush3.xpose.msk.msra.mxu0 %vm277_vm0, %v1575_v51 }
 0x2b2   :  { %2290 = vmatprep.subr.mxu0 %v2345_v2 }
 0x2b5   :  { %2291 = vmatpush3.xpose.msk.msra.mxu0 %vm277_vm0, %v1574_v42 }
 0x2b6   :  { %2292 = vmatprep.subr.mxu0 %v2345_v2 }
 0x2b9   :  { %2293 = vmatpush3.xpose.msk.msra.mxu0 %vm277_vm0, %v1573_v55 }
 0x2ba   :  { %2294 = vmatprep.subr.mxu0 %v2345_v2 }
 0x2bd   :  { %2295 = vmatpush3.xpose.msk.msra.mxu0 %vm277_vm0, %v1572_v27 }
 0x2be   :  { %2296 = vmatprep.subr.mxu0 %v2345_v2 }
 0x2c1   :  { %2297 = vmatpush3.xpose.msk.msra.mxu0 %vm277_vm0, %v1571_v39 }
 0x2c2   :  { %2298 = vmatprep.subr.mxu0 %v2345_v2 }
 0x2c5   :  { %2299 = vmatpush3.xpose.msk.msra.mxu0 %vm277_vm0, %v1570_v34 }
 0x2c6   :  { %2300 = vmatprep.subr.mxu0 %v2345_v2 }
 0x2c9   :  { %2301 = vmatpush3.xpose.msk.msra.mxu0 %vm277_vm0, %v1569_v46 }
 0x2cc   :  { %2303 = vmatmul.mubr.msk.f32.vlgmr.msra.gmra.mxu0 %vm277_vm0, %v3340_v28 }
 0x34c   :  { %v1809_v59 = vpop.f32.mrf.mxu0 }
 0x34d   :  { %v1810_v61 = vadd.f32 %v1809_v59, %v1595_v40 }
 0x34e   :  { %v1811_v60 = vpop.f32.mrf.mxu0 }
 0x34f   :  { %v1812_v62 = vadd.f32 %v1811_v60, %v1595_v40  ;;  %v1884_v49 = vsub.f32 0.0, %v1810_v61 }
 0x351   :  { %v1885_v32 = vsub.f32 0.0, %v1812_v62  ;;  %v1887_v24 = vmul.f32 1.442695, %v1884_v49 }
 0x353   :  { %v1889_v37 = vmul.f32 1.442695, %v1885_v32  ;;  %2311 = vpow2.f32 %v1887_v24 }
 0x355   :  { %2313 = vpow2.f32 %v1889_v37 }
 0x360   :  { %v2312_v4 = vpop.eup %2311 }
 0x361   :  { %v1893_v38 = vadd.f32 1.0, %v2312_v4 }
 0x362   :  { %v2314_v21 = vpop.eup %2313 }
 0x363   :  { %v1894_v5 = vadd.f32 1.0, %v2314_v21 }
 0x38c   :  { %v1880_v2 = vpop.f32.mrf.mxu0 }
 0x38d   :  { %v1881_v63 = vadd.f32 %v1880_v2, %v1595_v40 }
 0x38e   :  { %v2304_v0 = vpop.f32.mrf.mxu0 }
 0x38f   :  { %v1886_v1 = vsub.f32 0.0, %v1881_v63 }
 0x391   :  { %v1891_v28 = vmul.f32 1.442695, %v1886_v1 }
 0x393   :  { %2315 = vpow2.f32 %v1891_v28 }
 0x394   :  { %2317 = vrcp.f32 %v1893_v38 }
 0x395   :  { %2319 = vrcp.f32 %v1894_v5 }
 0x3a0   :  { %v2316_v6 = vpop.eup %2315 }
 0x3a1   :  { %v1895_v7 = vadd.f32 1.0, %v2316_v6  ;;  %v2318_v8 = vpop.eup %2317 }
 0x3a2   :  { %v2320_v10 = vpop.eup %2319 }
 0x3a3   :  { %2321 = vrcp.f32 %v1895_v7  ;;  %v1905_v11 = vcombine.low %v2318_v8, %v2320_v10 }
 0x3a5   :  { %v1912_v36 = vrot.slane %v1905_v11, %v1911_v19 }
 0x3b0   :  { %v2322_v12 = vpop.eup %2321 }
 0x3b1   :  { %v1919_v13 = vrot.slane %v2322_v12, %v1911_v19 }
 0x3b3   :  { %v1920_v14 = vcombine.low %v1912_v36, %v1919_v13 }
 0x3b5   :  { %v1927_v20 = vrot.slane %v1920_v14, %v1911_v19 }
 0x3b7   :  { %1933 = vst.msk [vmem:[#allocation3] sm:$0x7] %vm1931_vm2, %v1927_v20 }
 0x3b8   :  { %2334 = shalt.err (!%p2331_p4)
}
 0x3b9   :  { %1943 = dma.vmem_to_hbm [thread:$0]  %s1941_s11, 48, %s3531_s7, [#allocation4]  }
 0x3ba   :  { %2343 = dma.done.wait [#allocation4], 48  }
 0x3bb   :  { %2344 = vsyncadd [#allocation4], 4294967248 }
 0x3bc   :  { %1947 = vsyncpa [#allocation4], 1 }

</bundles_post_ra>
